<compile_context>
chip_gen: v7x
topology: tpu7x:2x2x1
jax: 0.10.0
libtpu: 0.0.40
codegen_flags: <defaults>
</compile_context>

<pallas_src>
import math
import functools

import jax
import jax.numpy as jnp
from jax.experimental import pallas as pl
from jax.experimental.pallas import tpu as pltpu


_LN_EPS = 1e-12                      # HF ViT layer_norm_eps


# ----------------------------- device tuning -----------------------------

@functools.lru_cache(maxsize=None)
def _device_kind():
    try:
        return jax.devices()[0].device_kind.lower()
    except Exception:
        return ""


def _vmem_limit_bytes():
    k = _device_kind()
    if "v5" in k or "v6" in k:       # 128 MiB physical VMEM
        return 100 * 1024 * 1024
    return 48 * 1024 * 1024          # conservative: v7x has only 64 MiB


def _row_tile_target():
    k = _device_kind()
    if "v5" in k or "v6" in k:
        return 512
    return 256


def _cparams(semantics):
    return pltpu.CompilerParams(dimension_semantics=semantics,
                                vmem_limit_bytes=_vmem_limit_bytes())


def _row_tile(batch, s_pad, target):
    """Row tile in whole multiples of s_pad, so it always divides M = B*s_pad."""
    k = max(1, min(batch, target // s_pad))
    while batch % k:
        k -= 1
    return k * s_pad


def _const_spec(shape):
    """BlockSpec for a weight/bias whose block never changes: single-buffer it."""
    nd = len(shape)
    idx = lambda *_args: (0,) * nd
    try:
        return pl.BlockSpec(shape, idx, pipeline_mode=pl.Buffered(1))
    except Exception:                # older JAX without pipeline_mode support
        return pl.BlockSpec(shape, idx)


# ----------------------------- Pallas kernels -----------------------------

def _embed_kernel(p_ref, w_ref, b_ref, cls_ref, pos_ref, o_ref, tile_ref,
                  *, n_patch):
    # Patch matmul + CLS row + positional embedding + sequence pad, fused.
    emb = jnp.dot(p_ref[0].astype(jnp.bfloat16), w_ref[...],
                  preferred_element_type=jnp.float32) + b_ref[...]
    tile_ref[...] = jnp.zeros_like(tile_ref)
    tile_ref[0:1, :] = cls_ref[...] + pos_ref[0:1, :]
    tile_ref[1:1 + n_patch, :] = emb + pos_ref[1:1 + n_patch, :]
    o_ref[...] = tile_ref[...][None, :, :].astype(o_ref.dtype)


def pallas_embed(patches, patch_w, patch_b, cls_token, pos_emb_pad, s_pad):
    B, n_patch, cpp = patches.shape
    H = patch_w.shape[1]
    return pl.pallas_call(
        functools.partial(_embed_kernel, n_patch=n_patch),
        out_shape=jax.ShapeDtypeStruct((B, s_pad, H), jnp.bfloat16),
        grid=(B,),
        in_specs=[pl.BlockSpec((1, n_patch, cpp), lambda b: (b, 0, 0)),
                  _const_spec((cpp, H)),
                  _const_spec((1, H)),
                  _const_spec((1, H)),
                  _const_spec((s_pad, H))],
        out_specs=pl.BlockSpec((1, s_pad, H), lambda b: (b, 0, 0)),
        scratch_shapes=[pltpu.VMEM((s_pad, H), jnp.float32)],
        compiler_params=_cparams(("parallel",)),
    )(patches, patch_w, patch_b.reshape(1, H), cls_token.reshape(1, H),
      pos_emb_pad)


def _ln_qkv_kernel(x_ref, g_ref, bln_ref, w_ref, b_ref, o_ref, *, eps):
    # Fused LayerNorm -> single (H, 3H) QKV projection.  bf16 in/out, f32 stats.
    x = x_ref[...].astype(jnp.float32)
    mean = jnp.mean(x, axis=-1, keepdims=True)
    xc = x - mean
    var = jnp.mean(xc * xc, axis=-1, keepdims=True)
    xn = (xc * jax.lax.rsqrt(var + eps)) * g_ref[...] + bln_ref[...]
    o_ref[...] = (jnp.dot(xn.astype(jnp.bfloat16), w_ref[...],
                          preferred_element_type=jnp.float32)
                  + b_ref[...]).astype(o_ref.dtype)


def pallas_ln_qkv(x, g, b_ln, qkv_w, qkv_b, tm):
    M, H = x.shape
    N = qkv_w.shape[1]                           # 3H
    return pl.pallas_call(
        functools.partial(_ln_qkv_kernel, eps=_LN_EPS),
        out_shape=jax.ShapeDtypeStruct((M, N), jnp.bfloat16),
        grid=(M // tm,),
        in_specs=[pl.BlockSpec((tm, H), lambda i: (i, 0)),
                  _const_spec((1, H)),
                  _const_spec((1, H)),
                  _const_spec((H, N)),
                  _const_spec((1, N))],
        out_specs=pl.BlockSpec((tm, N), lambda i: (i, 0)),
        compiler_params=_cparams(("parallel",)),
    )(x, g.reshape(1, H), b_ln.reshape(1, H), qkv_w, qkv_b.reshape(1, N))


def _attention_kernel(q_ref, k_ref, v_ref, o_ref, *, scale, s_real, hpb, dh):
    # q/k/v refs: (S_pad, hpb*Dh) bf16 column blocks of the qkv buffer.
    s_pad = q_ref.shape[0]
    col = jax.lax.broadcasted_iota(jnp.int32, (s_pad, s_pad), 1)
    kmask = col < s_real                         # mask padded key positions
    ctx_heads = []
    for hh in range(hpb):
        sl = slice(hh * dh, (hh + 1) * dh)
        q = q_ref[:, sl] * scale                 # bf16
        k = k_ref[:, sl]
        v = v_ref[:, sl]
        s = jax.lax.dot_general(q, k, (((1,), (1,)), ((), ())),
                                preferred_element_type=jnp.float32)  # q @ k^T
        s = jnp.where(kmask, s, -1e30)
        s = s - jnp.max(s, axis=-1, keepdims=True)
        p = jnp.exp(s)
        p = p * pl.reciprocal(jnp.sum(p, axis=-1, keepdims=True), approx=True)
        ctx_heads.append(jnp.dot(p.astype(jnp.bfloat16), v,
                                 preferred_element_type=jnp.float32))
    ctx = ctx_heads[0] if hpb == 1 else jnp.concatenate(ctx_heads, axis=-1)
    o_ref[...] = ctx.astype(o_ref.dtype)         # lane-dense (S_pad, 128) store


def pallas_attention(qkv, batch, s_pad, n_heads, dh, s_real):
    """qkv: (M, 3H) bf16 with columns [Q | K | V]; returns ctx (M, H) bf16."""
    M, n3 = qkv.shape
    H = n3 // 3
    if dh % 128 == 0:
        hpb = 1
    else:
        assert 128 % dh == 0 and n_heads % (128 // dh) == 0, \
            "head_dim must divide 128 and heads must pack into 128-lane blocks"
        hpb = 128 // dh
    lane = hpb * dh                              # 128-lane-dense head block
    qcb = H // lane                              # column blocks per Q/K/V section
    scale = 1.0 / math.sqrt(dh)
    # TODO(synk): for long sequences switch to a flash-style KV-tiled kernel
    # with online-softmax scratch instead of materializing S_pad x S_pad scores.
    return pl.pallas_call(
        functools.partial(_attention_kernel, scale=scale, s_real=s_real,
                          hpb=hpb, dh=dh),
        out_shape=jax.ShapeDtypeStruct((M, H), jnp.bfloat16),
        grid=(batch, n_heads // hpb),
        in_specs=[pl.BlockSpec((s_pad, lane), lambda b, h: (b, h)),
                  pl.BlockSpec((s_pad, lane), lambda b, h: (b, qcb + h)),
                  pl.BlockSpec((s_pad, lane), lambda b, h: (b, 2 * qcb + h))],
        out_specs=pl.BlockSpec((s_pad, lane), lambda b, h: (b, h)),
        compiler_params=_cparams(("parallel", "parallel")),
    )(qkv, qkv, qkv)


def _attnout_mlp_kernel(ctx_ref, res_ref, ow_ref, ob_ref, g_ref, bln_ref,
                        w1_ref, b1_ref, w2_ref, b2_ref, o_ref, *, eps):
    # Fused: o-proj + residual + LN2 + fc1 + GELU + fc2 + residual.
    attn = jnp.dot(ctx_ref[...], ow_ref[...],
                   preferred_element_type=jnp.float32) + ob_ref[...]
    res1 = res_ref[...].astype(jnp.float32) + attn          # x + attention(x)
    mean = jnp.mean(res1, axis=-1, keepdims=True)
    xc = res1 - mean
    var = jnp.mean(xc * xc, axis=-1, keepdims=True)
    xn = (xc * jax.lax.rsqrt(var + eps)) * g_ref[...] + bln_ref[...]
    h1 = jnp.dot(xn.astype(jnp.bfloat16), w1_ref[...],
                 preferred_element_type=jnp.float32) + b1_ref[...]
    # TODO(synk): HF ViT uses exact erf-GELU; using tanh-approx GELU in-kernel.
    h1 = jax.nn.gelu(h1, approximate=True).astype(jnp.bfloat16)
    y = jnp.dot(h1, w2_ref[...], preferred_element_type=jnp.float32) + b2_ref[...]
    o_ref[...] = (res1 + y).astype(o_ref.dtype)


def pallas_attnout_mlp(ctx, res, o_w, o_b, g, b_ln, w1, b1, w2, b2, tm):
    M, H = res.shape
    I = w1.shape[1]
    return pl.pallas_call(
        functools.partial(_attnout_mlp_kernel, eps=_LN_EPS),
        out_shape=jax.ShapeDtypeStruct((M, H), jnp.bfloat16),
        grid=(M // tm,),
        in_specs=[pl.BlockSpec((tm, H), lambda i: (i, 0)),
                  pl.BlockSpec((tm, H), lambda i: (i, 0)),
                  _const_spec((H, H)),
                  _const_spec((1, H)),
                  _const_spec((1, H)),
                  _const_spec((1, H)),
                  _const_spec((H, I)),
                  _const_spec((1, I)),
                  _const_spec((I, H)),
                  _const_spec((1, H))],
        out_specs=pl.BlockSpec((tm, H), lambda i: (i, 0)),
        compiler_params=_cparams(("parallel",)),
    )(ctx, res, o_w, o_b.reshape(1, H), g.reshape(1, H), b_ln.reshape(1, H),
      w1, b1.reshape(1, I), w2, b2.reshape(1, H))


def _lnf_fc_l2_kernel(x_ref, g_ref, bln_ref, w_ref, b_ref, o_ref, *, eps):
    # Fused final LayerNorm -> fc -> L2 normalize (CLS rows only).
    x = x_ref[...].astype(jnp.float32)
    mean = jnp.mean(x, axis=-1, keepdims=True)
    xc = x - mean
    var = jnp.mean(xc * xc, axis=-1, keepdims=True)
    xn = (xc * jax.lax.rsqrt(var + eps)) * g_ref[...] + bln_ref[...]
    y = jnp.dot(xn.astype(jnp.bfloat16), w_ref[...],
                preferred_element_type=jnp.float32) + b_ref[...]
    ssq = jnp.sum(y * y, axis=-1, keepdims=True)
    # torch F.normalize(p=2): y / clamp_min(||y||, 1e-12) == y * rsqrt(max(ssq, 1e-24))
    inv = jax.lax.rsqrt(jnp.maximum(ssq, 1e-24))
    o_ref[...] = (y * inv).astype(o_ref.dtype)


def pallas_lnf_fc_l2(cls_tok, g, b_ln, fc_w, fc_b):
    B, H = cls_tok.shape
    F = fc_w.shape[1]
    return pl.pallas_call(
        functools.partial(_lnf_fc_l2_kernel, eps=_LN_EPS),
        out_shape=jax.ShapeDtypeStruct((B, F), jnp.float32),
        grid=(1,),
        in_specs=[pl.BlockSpec((B, H), lambda i: (0, 0)),
                  _const_spec((1, H)),
                  _const_spec((1, H)),
                  _const_spec((H, F)),
                  _const_spec((1, F))],
        out_specs=pl.BlockSpec((B, F), lambda i: (0, 0)),
        compiler_params=_cparams(("arbitrary",)),
    )(cls_tok, g.reshape(1, H), b_ln.reshape(1, H), fc_w, fc_b.reshape(1, F))


# ----------------------------- Parameters -----------------------------

def init_params(key, cfg):
    # TODO(synk): ViTModel.from_pretrained weight loading is replaced by
    # deterministic synthetic init (no file/network access allowed here).
    C, P, H = cfg["channels"], cfg["patch"], cfg["hidden"]
    L, I, F = cfg["layers"], cfg["mlp"], cfg["feat_dim"]
    n_patch = (cfg["img"] // P) ** 2
    S = n_patch + 1
    S_pad = ((S + 15) // 16) * 16

    keys = iter(jax.random.split(key, 8 + 8 * L))

    def nrm(shape, dtype=jnp.float32):
        return (0.02 * jax.random.normal(next(keys), shape,
                                         dtype=jnp.float32)).astype(dtype)

    pos = nrm((S, H))
    pos_pad = jnp.pad(pos, ((0, S_pad - S), (0, 0)))         # (S_pad, H)

    params = {
        # patch conv (kernel == stride == P) flattened to a matmul weight.
        "patch_w": nrm((C * P * P, H), jnp.bfloat16),
        "patch_b": jnp.zeros((H,), jnp.float32),
        "cls_token": nrm((H,)),
        "pos_emb": pos_pad,
        "lnf_g": jnp.ones((H,), jnp.float32),
        "lnf_b": jnp.zeros((H,), jnp.float32),
        "fc_w": nrm((H, F), jnp.bfloat16),
        "fc_b": jnp.zeros((F,), jnp.float32),
        "layers": [],
    }
    for _ in range(L):
        params["layers"].append({
            "ln1_g": jnp.ones((H,), jnp.float32), "ln1_b": jnp.zeros((H,), jnp.float32),
            # fused Q|K|V along the output axis: (H, 3H)
            "qkv_w": nrm((H, 3 * H), jnp.bfloat16),
            "qkv_b": jnp.zeros((3 * H,), jnp.float32),
            "o_w": nrm((H, H), jnp.bfloat16), "o_b": jnp.zeros((H,), jnp.float32),
            "ln2_g": jnp.ones((H,), jnp.float32), "ln2_b": jnp.zeros((H,), jnp.float32),
            "fc1_w": nrm((H, I), jnp.bfloat16), "fc1_b": jnp.zeros((I,), jnp.float32),
            "fc2_w": nrm((I, H), jnp.bfloat16), "fc2_b": jnp.zeros((H,), jnp.float32),
        })
    return params


# ----------------------------- Forward pass -----------------------------

def vit_face_forward(params, x, cfg):
    B, C, Himg, Wimg = x.shape
    P = cfg["patch"]
    hp, wp = Himg // P, Wimg // P
    n_patch = hp * wp
    H, nH = cfg["hidden"], cfg["heads"]
    Dh = H // nH
    S = n_patch + 1
    S_pad = ((S + 15) // 16) * 16               # bf16-sublane-aligned sequence
    M = B * S_pad
    tm = _row_tile(B, S_pad, _row_tile_target())

    # --- im2col for the patch "conv" (kernel == stride == P) ---
    patches = (x.reshape(B, C, hp, P, wp, P)
                 .transpose(0, 2, 4, 1, 3, 5)
                 .reshape(B, n_patch, C * P * P))

    # --- fused patch embed + CLS + pos-emb + pad -> (B, S_pad, H) bf16 ---
    h = pallas_embed(patches, params["patch_w"], params["patch_b"],
                     params["cls_token"], params["pos_emb"], S_pad)
    h = h.reshape(M, H)

    # --- transformer encoder layers (pre-LN, like HF ViT) ---
    for lyr in params["layers"]:
        qkv = pallas_ln_qkv(h, lyr["ln1_g"], lyr["ln1_b"],
                            lyr["qkv_w"], lyr["qkv_b"], tm)          # (M, 3H) bf16
        ctx = pallas_attention(qkv, B, S_pad, nH, Dh, S)             # (M, H) bf16
        h = pallas_attnout_mlp(ctx, h, lyr["o_w"], lyr["o_b"],
                               lyr["ln2_g"], lyr["ln2_b"],
                               lyr["fc1_w"], lyr["fc1_b"],
                               lyr["fc2_w"], lyr["fc2_b"], tm)       # (M, H) bf16

    # --- CLS token -> fused final LayerNorm + fc + L2 normalize ---
    cls_tok = h.reshape(B, S_pad, H)[:, 0, :]                        # LN is per-row,
    return pallas_lnf_fc_l2(cls_tok, params["lnf_g"], params["lnf_b"],
                            params["fc_w"], params["fc_b"])          # so CLS-only is exact


# ----------------------------- Main -----------------------------

if __name__ == "__main__":
    # lane/sublane-friendly toy config: 2x2 = 4 patches + CLS -> S=5 padded to 16,
    # hidden / mlp / feat_dim multiples of 128, heads*Dh = 128 (one head-pair).
    cfg = dict(channels=3, img=16, patch=8,
               hidden=128, heads=2, layers=2, mlp=256, feat_dim=128)

    key = jax.random.PRNGKey(0)
    k_param, k_x = jax.random.split(key)
    params = init_params(k_param, cfg)
    x = jax.random.normal(k_x, (2, cfg["channels"], cfg["img"], cfg["img"]),
                          dtype=jnp.float32)

    fwd = jax.jit(lambda p, xx: vit_face_forward(p, xx, cfg))
    out = jax.block_until_ready(fwd(params, x))

    assert out.shape == (2, cfg["feat_dim"])
    # sanity: rows are unit-norm after L2 normalize
    norms = jnp.linalg.norm(out, axis=1)
    assert bool(jnp.all(jnp.abs(norms - 1.0) < 1e-3))
    print("KERNEL_OK")
</pallas_src>

<mosaic_0001>
module attributes {stable_mosaic.version = 11 : i64} {
  func.func @_embed_kernel(%arg0: i32, %arg1: memref<1x4x192xf32, #tpu.memory_space<vmem>>, %arg2: memref<192x128xbf16, #tpu.memory_space<vmem>>, %arg3: memref<1x128xf32, #tpu.memory_space<vmem>>, %arg4: memref<1x128xf32, #tpu.memory_space<vmem>>, %arg5: memref<16x128xf32, #tpu.memory_space<vmem>>, %arg6: memref<1x16x128xbf16, #tpu.memory_space<vmem>>, %arg7: memref<16x128xf32, #tpu.memory_space<vmem>>) attributes {dimension_semantics = [#tpu.dimension_semantics<parallel>], iteration_bounds = array<i64: 2>, scalar_prefetch = 0 : i64, scratch_operands = 1 : i64, tpu.core_type = #tpu.core_type<tc>, window_params = [{transform_indices = @transform_0, window_bounds = array<i64: 1, 4, 192>}, {pipeline_mode = #tpu.pipeline_mode<synchronous>, transform_indices = @transform_1, window_bounds = array<i64: 192, 128>}, {pipeline_mode = #tpu.pipeline_mode<synchronous>, transform_indices = @transform_2, window_bounds = array<i64: 1, 128>}, {pipeline_mode = #tpu.pipeline_mode<synchronous>, transform_indices = @transform_3, window_bounds = array<i64: 1, 128>}, {pipeline_mode = #tpu.pipeline_mode<synchronous>, transform_indices = @transform_4, window_bounds = array<i64: 16, 128>}, {transform_indices = @transform_5, window_bounds = array<i64: 1, 16, 128>}]} {
    %c0 = arith.constant 0 : index
    %c0_0 = arith.constant 0 : index
    %c0_1 = arith.constant 0 : index
    %0 = vector.load %arg1[%c0, %c0_0, %c0_1] : memref<1x4x192xf32, #tpu.memory_space<vmem>>, vector<1x4x192xf32>
    %1 = vector.shape_cast %0 : vector<1x4x192xf32> to vector<4x192xf32>
    %2 = arith.truncf %1 : vector<4x192xf32> to vector<4x192xbf16>
    %c0_2 = arith.constant 0 : index
    %c0_3 = arith.constant 0 : index
    %3 = vector.load %arg2[%c0_2, %c0_3] : memref<192x128xbf16, #tpu.memory_space<vmem>>, vector<192x128xbf16>
    %cst = arith.constant dense<0.000000e+00> : vector<4x128xf32>
    %4 = tpu.matmul %2, %3, %cst {dimension_numbers = #tpu.dot_dimension_numbers<[1], [0], [0], [1], [0, 0, 1, 1], [], []>} : vector<4x192xbf16>, vector<192x128xbf16>, vector<4x128xf32> -> vector<4x128xf32>
    %c0_4 = arith.constant 0 : index
    %c0_5 = arith.constant 0 : index
    %5 = vector.load %arg3[%c0_4, %c0_5] : memref<1x128xf32, #tpu.memory_space<vmem>>, vector<1x128xf32>
    %6 = vector.broadcast %5 : vector<1x128xf32> to vector<4x128xf32>
    %7 = arith.addf %4, %6 : vector<4x128xf32>
    %cst_6 = arith.constant 0.000000e+00 : f32
    %8 = vector.broadcast %cst_6 : f32 to vector<16x128xf32>
    %c0_7 = arith.constant 0 : index
    %c0_8 = arith.constant 0 : index
    %9 = vector.load %arg7[%c0_7, %c0_8] : memref<16x128xf32, #tpu.memory_space<vmem>>, vector<16x128xf32>
    tpu.vector_store %arg7[%c0_7, %c0_8], %8 {strides = array<i32>} : memref<16x128xf32, #tpu.memory_space<vmem>>, vector<16x128xf32>,
    %c0_9 = arith.constant 0 : index
    %c0_10 = arith.constant 0 : index
    %10 = vector.load %arg4[%c0_9, %c0_10] : memref<1x128xf32, #tpu.memory_space<vmem>>, vector<1x128xf32>
    %c0_11 = arith.constant 0 : index
    %c0_12 = arith.constant 0 : index
    %11 = vector.load %arg5[%c0_11, %c0_12] : memref<16x128xf32, #tpu.memory_space<vmem>>, vector<1x128xf32>
    %12 = arith.addf %10, %11 : vector<1x128xf32>
    %c0_13 = arith.constant 0 : index
    %c0_14 = arith.constant 0 : index
    %13 = vector.load %arg7[%c0_13, %c0_14] : memref<16x128xf32, #tpu.memory_space<vmem>>, vector<1x128xf32>
    tpu.vector_store %arg7[%c0_13, %c0_14], %12 {strides = array<i32>} : memref<16x128xf32, #tpu.memory_space<vmem>>, vector<1x128xf32>,
    %c1 = arith.constant 1 : index
    %c0_15 = arith.constant 0 : index
    %14 = vector.load %arg5[%c1, %c0_15] : memref<16x128xf32, #tpu.memory_space<vmem>>, vector<4x128xf32>
    %15 = arith.addf %7, %14 : vector<4x128xf32>
    %c1_16 = arith.constant 1 : index
    %c0_17 = arith.constant 0 : index
    %16 = vector.load %arg7[%c1_16, %c0_17] : memref<16x128xf32, #tpu.memory_space<vmem>>, vector<4x128xf32>
    tpu.vector_store %arg7[%c1_16, %c0_17], %15 {strides = array<i32>} : memref<16x128xf32, #tpu.memory_space<vmem>>, vector<4x128xf32>,
    %c0_18 = arith.constant 0 : index
    %c0_19 = arith.constant 0 : index
    %17 = vector.load %arg7[%c0_18, %c0_19] : memref<16x128xf32, #tpu.memory_space<vmem>>, vector<16x128xf32>
    %18 = vector.shape_cast %17 : vector<16x128xf32> to vector<1x16x128xf32>
    %19 = arith.truncf %18 : vector<1x16x128xf32> to vector<1x16x128xbf16>
    %c0_20 = arith.constant 0 : index
    %c0_21 = arith.constant 0 : index
    %c0_22 = arith.constant 0 : index
    %20 = vector.load %arg6[%c0_20, %c0_21, %c0_22] : memref<1x16x128xbf16, #tpu.memory_space<vmem>>, vector<1x16x128xbf16>
    tpu.vector_store %arg6[%c0_20, %c0_21, %c0_22], %19 {strides = array<i32>} : memref<1x16x128xbf16, #tpu.memory_space<vmem>>, vector<1x16x128xbf16>,
    return
  }
  func.func @transform_0(%arg0: i32) -> (i32, i32, i32) {
    %c0_i32 = arith.constant 0 : i32
    %c0_i32_0 = arith.constant 0 : i32
    %c0_i32_1 = arith.constant 0 : i32
    return %arg0, %c0_i32, %c0_i32_0 : i32, i32, i32
  }
  func.func @transform_1(%arg0: i32) -> (i32, i32) {
    %c0_i32 = arith.constant 0 : i32
    %c0_i32_0 = arith.constant 0 : i32
    %c0_i32_1 = arith.constant 0 : i32
    return %c0_i32, %c0_i32_0 : i32, i32
  }
  func.func @transform_2(%arg0: i32) -> (i32, i32) {
    %c0_i32 = arith.constant 0 : i32
    %c0_i32_0 = arith.constant 0 : i32
    %c0_i32_1 = arith.constant 0 : i32
    return %c0_i32, %c0_i32_0 : i32, i32
  }
  func.func @transform_3(%arg0: i32) -> (i32, i32) {
    %c0_i32 = arith.constant 0 : i32
    %c0_i32_0 = arith.constant 0 : i32
    %c0_i32_1 = arith.constant 0 : i32
    return %c0_i32, %c0_i32_0 : i32, i32
  }
  func.func @transform_4(%arg0: i32) -> (i32, i32) {
    %c0_i32 = arith.constant 0 : i32
    %c0_i32_0 = arith.constant 0 : i32
    %c0_i32_1 = arith.constant 0 : i32
    return %c0_i32, %c0_i32_0 : i32, i32
  }
  func.func @transform_5(%arg0: i32) -> (i32, i32, i32) {
    %c0_i32 = arith.constant 0 : i32
    %c0_i32_0 = arith.constant 0 : i32
    %c0_i32_1 = arith.constant 0 : i32
    return %arg0, %c0_i32, %c0_i32_0 : i32, i32, i32
  }
}

module attributes {stable_mosaic.version = 11 : i64} {
  func.func @_ln_qkv_kernel(%arg0: i32, %arg1: memref<32x128xbf16, #tpu.memory_space<vmem>>, %arg2: memref<1x128xf32, #tpu.memory_space<vmem>>, %arg3: memref<1x128xf32, #tpu.memory_space<vmem>>, %arg4: memref<128x384xbf16, #tpu.memory_space<vmem>>, %arg5: memref<1x384xf32, #tpu.memory_space<vmem>>, %arg6: memref<32x384xbf16, #tpu.memory_space<vmem>>) attributes {dimension_semantics = [#tpu.dimension_semantics<parallel>], iteration_bounds = array<i64: 1>, scalar_prefetch = 0 : i64, scratch_operands = 0 : i64, tpu.core_type = #tpu.core_type<tc>, window_params = [{transform_indices = @transform_0, window_bounds = array<i64: 32, 128>}, {pipeline_mode = #tpu.pipeline_mode<synchronous>, transform_indices = @transform_1, window_bounds = array<i64: 1, 128>}, {pipeline_mode = #tpu.pipeline_mode<synchronous>, transform_indices = @transform_2, window_bounds = array<i64: 1, 128>}, {pipeline_mode = #tpu.pipeline_mode<synchronous>, transform_indices = @transform_3, window_bounds = array<i64: 128, 384>}, {pipeline_mode = #tpu.pipeline_mode<synchronous>, transform_indices = @transform_4, window_bounds = array<i64: 1, 384>}, {transform_indices = @transform_5, window_bounds = array<i64: 32, 384>}]} {
    %c0 = arith.constant 0 : index
    %c0_0 = arith.constant 0 : index
    %0 = vector.load %arg1[%c0, %c0_0] : memref<32x128xbf16, #tpu.memory_space<vmem>>, vector<32x128xbf16>
    %1 = arith.extf %0 : vector<32x128xbf16> to vector<32x128xf32>
    %cst = arith.constant dense<0.000000e+00> : vector<32xf32>
    %2 = vector.multi_reduction <add>, %1, %cst [1] : vector<32x128xf32> to vector<32xf32>
    %3 = vector.shape_cast %2 : vector<32xf32> to vector<32x1xf32>
    %cst_1 = arith.constant 1.280000e+02 : f32
    %4 = vector.broadcast %cst_1 : f32 to vector<32x1xf32>
    %5 = arith.divf %3, %4 : vector<32x1xf32>
    %6 = vector.broadcast %5 : vector<32x1xf32> to vector<32x128xf32>
    %7 = arith.subf %1, %6 : vector<32x128xf32>
    %8 = arith.mulf %7, %7 : vector<32x128xf32>
    %cst_2 = arith.constant dense<0.000000e+00> : vector<32xf32>
    %9 = vector.multi_reduction <add>, %8, %cst_2 [1] : vector<32x128xf32> to vector<32xf32>
    %10 = vector.shape_cast %9 : vector<32xf32> to vector<32x1xf32>
    %cst_3 = arith.constant 1.280000e+02 : f32
    %11 = vector.broadcast %cst_3 : f32 to vector<32x1xf32>
    %12 = arith.divf %10, %11 : vector<32x1xf32>
    %cst_4 = arith.constant 9.99999996E-13 : f32
    %13 = vector.broadcast %cst_4 : f32 to vector<32x1xf32>
    %14 = arith.addf %12, %13 : vector<32x1xf32>
    %15 = math.rsqrt %14 : vector<32x1xf32>
    %16 = vector.broadcast %15 : vector<32x1xf32> to vector<32x128xf32>
    %17 = arith.mulf %7, %16 : vector<32x128xf32>
    %c0_5 = arith.constant 0 : index
    %c0_6 = arith.constant 0 : index
    %18 = vector.load %arg2[%c0_5, %c0_6] : memref<1x128xf32, #tpu.memory_space<vmem>>, vector<1x128xf32>
    %19 = vector.broadcast %18 : vector<1x128xf32> to vector<32x128xf32>
    %20 = arith.mulf %17, %19 : vector<32x128xf32>
    %c0_7 = arith.constant 0 : index
    %c0_8 = arith.constant 0 : index
    %21 = vector.load %arg3[%c0_7, %c0_8] : memref<1x128xf32, #tpu.memory_space<vmem>>, vector<1x128xf32>
    %22 = vector.broadcast %21 : vector<1x128xf32> to vector<32x128xf32>
    %23 = arith.addf %20, %22 : vector<32x128xf32>
    %24 = arith.truncf %23 : vector<32x128xf32> to vector<32x128xbf16>
    %c0_9 = arith.constant 0 : index
    %c0_10 = arith.constant 0 : index
    %25 = vector.load %arg4[%c0_9, %c0_10] : memref<128x384xbf16, #tpu.memory_space<vmem>>, vector<128x384xbf16>
    %cst_11 = arith.constant dense<0.000000e+00> : vector<32x384xf32>
    %26 = tpu.matmul %24, %25, %cst_11 {dimension_numbers = #tpu.dot_dimension_numbers<[1], [0], [0], [1], [0, 0, 1, 1], [], []>} : vector<32x128xbf16>, vector<128x384xbf16>, vector<32x384xf32> -> vector<32x384xf32>
    %c0_12 = arith.constant 0 : index
    %c0_13 = arith.constant 0 : index
    %27 = vector.load %arg5[%c0_12, %c0_13] : memref<1x384xf32, #tpu.memory_space<vmem>>, vector<1x384xf32>
    %28 = vector.broadcast %27 : vector<1x384xf32> to vector<32x384xf32>
    %29 = arith.addf %26, %28 : vector<32x384xf32>
    %30 = arith.truncf %29 : vector<32x384xf32> to vector<32x384xbf16>
    %c0_14 = arith.constant 0 : index
    %c0_15 = arith.constant 0 : index
    %31 = vector.load %arg6[%c0_14, %c0_15] : memref<32x384xbf16, #tpu.memory_space<vmem>>, vector<32x384xbf16>
    tpu.vector_store %arg6[%c0_14, %c0_15], %30 {strides = array<i32>} : memref<32x384xbf16, #tpu.memory_space<vmem>>, vector<32x384xbf16>,
    return
  }
  func.func @transform_0(%arg0: i32) -> (i32, i32) {
    %c0_i32 = arith.constant 0 : i32
    %c0_i32_0 = arith.constant 0 : i32
    return %arg0, %c0_i32 : i32, i32
  }
  func.func @transform_1(%arg0: i32) -> (i32, i32) {
    %c0_i32 = arith.constant 0 : i32
    %c0_i32_0 = arith.constant 0 : i32
    %c0_i32_1 = arith.constant 0 : i32
    return %c0_i32, %c0_i32_0 : i32, i32
  }
  func.func @transform_2(%arg0: i32) -> (i32, i32) {
    %c0_i32 = arith.constant 0 : i32
    %c0_i32_0 = arith.constant 0 : i32
    %c0_i32_1 = arith.constant 0 : i32
    return %c0_i32, %c0_i32_0 : i32, i32
  }
  func.func @transform_3(%arg0: i32) -> (i32, i32) {
    %c0_i32 = arith.constant 0 : i32
    %c0_i32_0 = arith.constant 0 : i32
    %c0_i32_1 = arith.constant 0 : i32
    return %c0_i32, %c0_i32_0 : i32, i32
  }
  func.func @transform_4(%arg0: i32) -> (i32, i32) {
    %c0_i32 = arith.constant 0 : i32
    %c0_i32_0 = arith.constant 0 : i32
    %c0_i32_1 = arith.constant 0 : i32
    return %c0_i32, %c0_i32_0 : i32, i32
  }
  func.func @transform_5(%arg0: i32) -> (i32, i32) {
    %c0_i32 = arith.constant 0 : i32
    %c0_i32_0 = arith.constant 0 : i32
    return %arg0, %c0_i32 : i32, i32
  }
}

module attributes {stable_mosaic.version = 11 : i64} {
  func.func @_attention_kernel(%arg0: i32, %arg1: i32, %arg2: memref<16x128xbf16, #tpu.memory_space<vmem>>, %arg3: memref<16x128xbf16, #tpu.memory_space<vmem>>, %arg4: memref<16x128xbf16, #tpu.memory_space<vmem>>, %arg5: memref<16x128xbf16, #tpu.memory_space<vmem>>) attributes {dimension_semantics = [#tpu.dimension_semantics<parallel>, #tpu.dimension_semantics<parallel>], iteration_bounds = array<i64: 2, 1>, scalar_prefetch = 0 : i64, scratch_operands = 0 : i64, tpu.core_type = #tpu.core_type<tc>, window_params = [{transform_indices = @transform_0, window_bounds = array<i64: 16, 128>}, {transform_indices = @transform_1, window_bounds = array<i64: 16, 128>}, {transform_indices = @transform_2, window_bounds = array<i64: 16, 128>}, {transform_indices = @transform_3, window_bounds = array<i64: 16, 128>}]} {
    %0 = tpu.iota {dimensions = array<i32: 1>} : vector<16x16xi32>
    %c5_i32 = arith.constant 5 : i32
    %1 = vector.broadcast %c5_i32 : i32 to vector<16x16xi32>
    %2 = arith.cmpi slt, %0, %1 : vector<16x16xi32>
    %c0 = arith.constant 0 : index
    %c0_0 = arith.constant 0 : index
    %3 = vector.load %arg2[%c0, %c0_0] : memref<16x128xbf16, #tpu.memory_space<vmem>>, vector<16x64xbf16>
    %cst = arith.constant 1.250000e-01 : bf16
    %4 = vector.broadcast %cst : bf16 to vector<16x64xbf16>
    %5 = arith.mulf %3, %4 : vector<16x64xbf16>
    %c0_1 = arith.constant 0 : index
    %c0_2 = arith.constant 0 : index
    %6 = vector.load %arg3[%c0_1, %c0_2] : memref<16x128xbf16, #tpu.memory_space<vmem>>, vector<16x64xbf16>
    %c0_3 = arith.constant 0 : index
    %c0_4 = arith.constant 0 : index
    %7 = vector.load %arg4[%c0_3, %c0_4] : memref<16x128xbf16, #tpu.memory_space<vmem>>, vector<16x64xbf16>
    %cst_5 = arith.constant dense<0.000000e+00> : vector<16x16xf32>
    %8 = tpu.matmul %5, %6, %cst_5 {dimension_numbers = #tpu.dot_dimension_numbers<[1], [1], [0], [0], [0, 0, 1, 0], [], []>} : vector<16x64xbf16>, vector<16x64xbf16>, vector<16x16xf32> -> vector<16x16xf32>
    %cst_6 = arith.constant -1.000000e+30 : f32
    %9 = vector.broadcast %cst_6 : f32 to vector<16x16xf32>
    %10 = arith.select %2, %8, %9 : vector<16x16xi1>, vector<16x16xf32>
    %cst_7 = arith.constant dense<0xFF800000> : vector<16xf32>
    %11 = vector.multi_reduction <maximumf>, %10, %cst_7 [1] : vector<16x16xf32> to vector<16xf32>
    %12 = vector.shape_cast %11 : vector<16xf32> to vector<16x1xf32>
    %13 = vector.broadcast %12 : vector<16x1xf32> to vector<16x16xf32>
    %14 = arith.subf %10, %13 : vector<16x16xf32>
    %15 = math.exp %14 : vector<16x16xf32>
    %cst_8 = arith.constant dense<0.000000e+00> : vector<16xf32>
    %16 = vector.multi_reduction <add>, %15, %cst_8 [1] : vector<16x16xf32> to vector<16xf32>
    %17 = vector.shape_cast %16 : vector<16xf32> to vector<16x1xf32>
    %18 = tpu.reciprocal %17 {approx = true} : vector<16x1xf32> -> vector<16x1xf32>
    %19 = vector.broadcast %18 : vector<16x1xf32> to vector<16x16xf32>
    %20 = arith.mulf %15, %19 : vector<16x16xf32>
    %21 = arith.truncf %20 : vector<16x16xf32> to vector<16x16xbf16>
    %cst_9 = arith.constant dense<0.000000e+00> : vector<16x64xf32>
    %22 = tpu.matmul %21, %7, %cst_9 {dimension_numbers = #tpu.dot_dimension_numbers<[1], [0], [0], [1], [0, 0, 1, 1], [], []>} : vector<16x16xbf16>, vector<16x64xbf16>, vector<16x64xf32> -> vector<16x64xf32>
    %c0_10 = arith.constant 0 : index
    %c64 = arith.constant 64 : index
    %23 = vector.load %arg2[%c0_10, %c64] : memref<16x128xbf16, #tpu.memory_space<vmem>>, vector<16x64xbf16>
    %cst_11 = arith.constant 1.250000e-01 : bf16
    %24 = vector.broadcast %cst_11 : bf16 to vector<16x64xbf16>
    %25 = arith.mulf %23, %24 : vector<16x64xbf16>
    %c0_12 = arith.constant 0 : index
    %c64_13 = arith.constant 64 : index
    %26 = vector.load %arg3[%c0_12, %c64_13] : memref<16x128xbf16, #tpu.memory_space<vmem>>, vector<16x64xbf16>
    %c0_14 = arith.constant 0 : index
    %c64_15 = arith.constant 64 : index
    %27 = vector.load %arg4[%c0_14, %c64_15] : memref<16x128xbf16, #tpu.memory_space<vmem>>, vector<16x64xbf16>
    %cst_16 = arith.constant dense<0.000000e+00> : vector<16x16xf32>
    %28 = tpu.matmul %25, %26, %cst_16 {dimension_numbers = #tpu.dot_dimension_numbers<[1], [1], [0], [0], [0, 0, 1, 0], [], []>} : vector<16x64xbf16>, vector<16x64xbf16>, vector<16x16xf32> -> vector<16x16xf32>
    %cst_17 = arith.constant -1.000000e+30 : f32
    %29 = vector.broadcast %cst_17 : f32 to vector<16x16xf32>
    %30 = arith.select %2, %28, %29 : vector<16x16xi1>, vector<16x16xf32>
    %cst_18 = arith.constant dense<0xFF800000> : vector<16xf32>
    %31 = vector.multi_reduction <maximumf>, %30, %cst_18 [1] : vector<16x16xf32> to vector<16xf32>
    %32 = vector.shape_cast %31 : vector<16xf32> to vector<16x1xf32>
    %33 = vector.broadcast %32 : vector<16x1xf32> to vector<16x16xf32>
    %34 = arith.subf %30, %33 : vector<16x16xf32>
    %35 = math.exp %34 : vector<16x16xf32>
    %cst_19 = arith.constant dense<0.000000e+00> : vector<16xf32>
    %36 = vector.multi_reduction <add>, %35, %cst_19 [1] : vector<16x16xf32> to vector<16xf32>
    %37 = vector.shape_cast %36 : vector<16xf32> to vector<16x1xf32>
    %38 = tpu.reciprocal %37 {approx = true} : vector<16x1xf32> -> vector<16x1xf32>
    %39 = vector.broadcast %38 : vector<16x1xf32> to vector<16x16xf32>
    %40 = arith.mulf %35, %39 : vector<16x16xf32>
    %41 = arith.truncf %40 : vector<16x16xf32> to vector<16x16xbf16>
    %cst_20 = arith.constant dense<0.000000e+00> : vector<16x64xf32>
    %42 = tpu.matmul %41, %27, %cst_20 {dimension_numbers = #tpu.dot_dimension_numbers<[1], [0], [0], [1], [0, 0, 1, 1], [], []>} : vector<16x16xbf16>, vector<16x64xbf16>, vector<16x64xf32> -> vector<16x64xf32>
    %43 = tpu.concatenate %22, %42 in 1 : vector<16x64xf32>, vector<16x64xf32> -> vector<16x128xf32>
    %44 = arith.truncf %43 : vector<16x128xf32> to vector<16x128xbf16>
    %c0_21 = arith.constant 0 : index
    %c0_22 = arith.constant 0 : index
    %45 = vector.load %arg5[%c0_21, %c0_22] : memref<16x128xbf16, #tpu.memory_space<vmem>>, vector<16x128xbf16>
    tpu.vector_store %arg5[%c0_21, %c0_22], %44 {strides = array<i32>} : memref<16x128xbf16, #tpu.memory_space<vmem>>, vector<16x128xbf16>,
    return
  }
  func.func @transform_0(%arg0: i32, %arg1: i32) -> (i32, i32) {
    %c0_i32 = arith.constant 0 : i32
    return %arg0, %arg1 : i32, i32
  }
  func.func @transform_1(%arg0: i32, %arg1: i32) -> (i32, i32) {
    %c1_i32 = arith.constant 1 : i32
    %0 = arith.addi %c1_i32, %arg1 : i32
    %c0_i32 = arith.constant 0 : i32
    return %arg0, %0 : i32, i32
  }
  func.func @transform_2(%arg0: i32, %arg1: i32) -> (i32, i32) {
    %c2_i32 = arith.constant 2 : i32
    %0 = arith.addi %c2_i32, %arg1 : i32
    %c0_i32 = arith.constant 0 : i32
    return %arg0, %0 : i32, i32
  }
  func.func @transform_3(%arg0: i32, %arg1: i32) -> (i32, i32) {
    %c0_i32 = arith.constant 0 : i32
    return %arg0, %arg1 : i32, i32
  }
}

module attributes {stable_mosaic.version = 11 : i64} {
  func.func @_attnout_mlp_kernel(%arg0: i32, %arg1: memref<32x128xbf16, #tpu.memory_space<vmem>>, %arg2: memref<32x128xbf16, #tpu.memory_space<vmem>>, %arg3: memref<128x128xbf16, #tpu.memory_space<vmem>>, %arg4: memref<1x128xf32, #tpu.memory_space<vmem>>, %arg5: memref<1x128xf32, #tpu.memory_space<vmem>>, %arg6: memref<1x128xf32, #tpu.memory_space<vmem>>, %arg7: memref<128x256xbf16, #tpu.memory_space<vmem>>, %arg8: memref<1x256xf32, #tpu.memory_space<vmem>>, %arg9: memref<256x128xbf16, #tpu.memory_space<vmem>>, %arg10: memref<1x128xf32, #tpu.memory_space<vmem>>, %arg11: memref<32x128xbf16, #tpu.memory_space<vmem>>) attributes {dimension_semantics = [#tpu.dimension_semantics<parallel>], iteration_bounds = array<i64: 1>, scalar_prefetch = 0 : i64, scratch_operands = 0 : i64, tpu.core_type = #tpu.core_type<tc>, window_params = [{transform_indices = @transform_0, window_bounds = array<i64: 32, 128>}, {transform_indices = @transform_1, window_bounds = array<i64: 32, 128>}, {pipeline_mode = #tpu.pipeline_mode<synchronous>, transform_indices = @transform_2, window_bounds = array<i64: 128, 128>}, {pipeline_mode = #tpu.pipeline_mode<synchronous>, transform_indices = @transform_3, window_bounds = array<i64: 1, 128>}, {pipeline_mode = #tpu.pipeline_mode<synchronous>, transform_indices = @transform_4, window_bounds = array<i64: 1, 128>}, {pipeline_mode = #tpu.pipeline_mode<synchronous>, transform_indices = @transform_5, window_bounds = array<i64: 1, 128>}, {pipeline_mode = #tpu.pipeline_mode<synchronous>, transform_indices = @transform_6, window_bounds = array<i64: 128, 256>}, {pipeline_mode = #tpu.pipeline_mode<synchronous>, transform_indices = @transform_7, window_bounds = array<i64: 1, 256>}, {pipeline_mode = #tpu.pipeline_mode<synchronous>, transform_indices = @transform_8, window_bounds = array<i64: 256, 128>}, {pipeline_mode = #tpu.pipeline_mode<synchronous>, transform_indices = @transform_9, window_bounds = array<i64: 1, 128>}, {transform_indices = @transform_10, window_bounds = array<i64: 32, 128>}]} {
    %c0 = arith.constant 0 : index
    %c0_0 = arith.constant 0 : index
    %0 = vector.load %arg1[%c0, %c0_0] : memref<32x128xbf16, #tpu.memory_space<vmem>>, vector<32x128xbf16>
    %c0_1 = arith.constant 0 : index
    %c0_2 = arith.constant 0 : index
    %1 = vector.load %arg3[%c0_1, %c0_2] : memref<128x128xbf16, #tpu.memory_space<vmem>>, vector<128x128xbf16>
    %cst = arith.constant dense<0.000000e+00> : vector<32x128xf32>
    %2 = tpu.matmul %0, %1, %cst {dimension_numbers = #tpu.dot_dimension_numbers<[1], [0], [0], [1], [0, 0, 1, 1], [], []>} : vector<32x128xbf16>, vector<128x128xbf16>, vector<32x128xf32> -> vector<32x128xf32>
    %c0_3 = arith.constant 0 : index
    %c0_4 = arith.constant 0 : index
    %3 = vector.load %arg4[%c0_3, %c0_4] : memref<1x128xf32, #tpu.memory_space<vmem>>, vector<1x128xf32>
    %4 = vector.broadcast %3 : vector<1x128xf32> to vector<32x128xf32>
    %5 = arith.addf %2, %4 : vector<32x128xf32>
    %c0_5 = arith.constant 0 : index
    %c0_6 = arith.constant 0 : index
    %6 = vector.load %arg2[%c0_5, %c0_6] : memref<32x128xbf16, #tpu.memory_space<vmem>>, vector<32x128xbf16>
    %7 = arith.extf %6 : vector<32x128xbf16> to vector<32x128xf32>
    %8 = arith.addf %7, %5 : vector<32x128xf32>
    %cst_7 = arith.constant dense<0.000000e+00> : vector<32xf32>
    %9 = vector.multi_reduction <add>, %8, %cst_7 [1] : vector<32x128xf32> to vector<32xf32>
    %10 = vector.shape_cast %9 : vector<32xf32> to vector<32x1xf32>
    %cst_8 = arith.constant 1.280000e+02 : f32
    %11 = vector.broadcast %cst_8 : f32 to vector<32x1xf32>
    %12 = arith.divf %10, %11 : vector<32x1xf32>
    %13 = vector.broadcast %12 : vector<32x1xf32> to vector<32x128xf32>
    %14 = arith.subf %8, %13 : vector<32x128xf32>
    %15 = arith.mulf %14, %14 : vector<32x128xf32>
    %cst_9 = arith.constant dense<0.000000e+00> : vector<32xf32>
    %16 = vector.multi_reduction <add>, %15, %cst_9 [1] : vector<32x128xf32> to vector<32xf32>
    %17 = vector.shape_cast %16 : vector<32xf32> to vector<32x1xf32>
    %cst_10 = arith.constant 1.280000e+02 : f32
    %18 = vector.broadcast %cst_10 : f32 to vector<32x1xf32>
    %19 = arith.divf %17, %18 : vector<32x1xf32>
    %cst_11 = arith.constant 9.99999996E-13 : f32
    %20 = vector.broadcast %cst_11 : f32 to vector<32x1xf32>
    %21 = arith.addf %19, %20 : vector<32x1xf32>
    %22 = math.rsqrt %21 : vector<32x1xf32>
    %23 = vector.broadcast %22 : vector<32x1xf32> to vector<32x128xf32>
    %24 = arith.mulf %14, %23 : vector<32x128xf32>
    %c0_12 = arith.constant 0 : index
    %c0_13 = arith.constant 0 : index
    %25 = vector.load %arg5[%c0_12, %c0_13] : memref<1x128xf32, #tpu.memory_space<vmem>>, vector<1x128xf32>
    %26 = vector.broadcast %25 : vector<1x128xf32> to vector<32x128xf32>
    %27 = arith.mulf %24, %26 : vector<32x128xf32>
    %c0_14 = arith.constant 0 : index
    %c0_15 = arith.constant 0 : index
    %28 = vector.load %arg6[%c0_14, %c0_15] : memref<1x128xf32, #tpu.memory_space<vmem>>, vector<1x128xf32>
    %29 = vector.broadcast %28 : vector<1x128xf32> to vector<32x128xf32>
    %30 = arith.addf %27, %29 : vector<32x128xf32>
    %31 = arith.truncf %30 : vector<32x128xf32> to vector<32x128xbf16>
    %c0_16 = arith.constant 0 : index
    %c0_17 = arith.constant 0 : index
    %32 = vector.load %arg7[%c0_16, %c0_17] : memref<128x256xbf16, #tpu.memory_space<vmem>>, vector<128x256xbf16>
    %cst_18 = arith.constant dense<0.000000e+00> : vector<32x256xf32>
    %33 = tpu.matmul %31, %32, %cst_18 {dimension_numbers = #tpu.dot_dimension_numbers<[1], [0], [0], [1], [0, 0, 1, 1], [], []>} : vector<32x128xbf16>, vector<128x256xbf16>, vector<32x256xf32> -> vector<32x256xf32>
    %c0_19 = arith.constant 0 : index
    %c0_20 = arith.constant 0 : index
    %34 = vector.load %arg8[%c0_19, %c0_20] : memref<1x256xf32, #tpu.memory_space<vmem>>, vector<1x256xf32>
    %35 = vector.broadcast %34 : vector<1x256xf32> to vector<32x256xf32>
    %36 = arith.addf %33, %35 : vector<32x256xf32>
    %37 = arith.mulf %36, %36 : vector<32x256xf32>
    %38 = arith.mulf %36, %37 : vector<32x256xf32>
    %cst_21 = arith.constant 4.471500e-02 : f32
    %39 = vector.broadcast %cst_21 : f32 to vector<32x256xf32>
    %40 = arith.mulf %39, %38 : vector<32x256xf32>
    %41 = arith.addf %36, %40 : vector<32x256xf32>
    %cst_22 = arith.constant 0.797884583 : f32
    %42 = vector.broadcast %cst_22 : f32 to vector<32x256xf32>
    %43 = arith.mulf %42, %41 : vector<32x256xf32>
    %44 = math.tanh %43 : vector<32x256xf32>
    %cst_23 = arith.constant 1.000000e+00 : f32
    %45 = vector.broadcast %cst_23 : f32 to vector<32x256xf32>
    %46 = arith.addf %45, %44 : vector<32x256xf32>
    %cst_24 = arith.constant 5.000000e-01 : f32
    %47 = vector.broadcast %cst_24 : f32 to vector<32x256xf32>
    %48 = arith.mulf %47, %46 : vector<32x256xf32>
    %49 = arith.mulf %36, %48 : vector<32x256xf32>
    %50 = arith.truncf %49 : vector<32x256xf32> to vector<32x256xbf16>
    %c0_25 = arith.constant 0 : index
    %c0_26 = arith.constant 0 : index
    %51 = vector.load %arg9[%c0_25, %c0_26] : memref<256x128xbf16, #tpu.memory_space<vmem>>, vector<256x128xbf16>
    %cst_27 = arith.constant dense<0.000000e+00> : vector<32x128xf32>
    %52 = tpu.matmul %50, %51, %cst_27 {dimension_numbers = #tpu.dot_dimension_numbers<[1], [0], [0], [1], [0, 0, 1, 1], [], []>} : vector<32x256xbf16>, vector<256x128xbf16>, vector<32x128xf32> -> vector<32x128xf32>
    %c0_28 = arith.constant 0 : index
    %c0_29 = arith.constant 0 : index
    %53 = vector.load %arg10[%c0_28, %c0_29] : memref<1x128xf32, #tpu.memory_space<vmem>>, vector<1x128xf32>
    %54 = vector.broadcast %53 : vector<1x128xf32> to vector<32x128xf32>
    %55 = arith.addf %52, %54 : vector<32x128xf32>
    %56 = arith.addf %8, %55 : vector<32x128xf32>
    %57 = arith.truncf %56 : vector<32x128xf32> to vector<32x128xbf16>
    %c0_30 = arith.constant 0 : index
    %c0_31 = arith.constant 0 : index
    %58 = vector.load %arg11[%c0_30, %c0_31] : memref<32x128xbf16, #tpu.memory_space<vmem>>, vector<32x128xbf16>
    tpu.vector_store %arg11[%c0_30, %c0_31], %57 {strides = array<i32>} : memref<32x128xbf16, #tpu.memory_space<vmem>>, vector<32x128xbf16>,
    return
  }
  func.func @transform_0(%arg0: i32) -> (i32, i32) {
    %c0_i32 = arith.constant 0 : i32
    %c0_i32_0 = arith.constant 0 : i32
    return %arg0, %c0_i32 : i32, i32
  }
  func.func @transform_1(%arg0: i32) -> (i32, i32) {
    %c0_i32 = arith.constant 0 : i32
    %c0_i32_0 = arith.constant 0 : i32
    return %arg0, %c0_i32 : i32, i32
  }
  func.func @transform_2(%arg0: i32) -> (i32, i32) {
    %c0_i32 = arith.constant 0 : i32
    %c0_i32_0 = arith.constant 0 : i32
    %c0_i32_1 = arith.constant 0 : i32
    return %c0_i32, %c0_i32_0 : i32, i32
  }
  func.func @transform_3(%arg0: i32) -> (i32, i32) {
    %c0_i32 = arith.constant 0 : i32
    %c0_i32_0 = arith.constant 0 : i32
    %c0_i32_1 = arith.constant 0 : i32
    return %c0_i32, %c0_i32_0 : i32, i32
  }
  func.func @transform_4(%arg0: i32) -> (i32, i32) {
    %c0_i32 = arith.constant 0 : i32
    %c0_i32_0 = arith.constant 0 : i32
    %c0_i32_1 = arith.constant 0 : i32
    return %c0_i32, %c0_i32_0 : i32, i32
  }
  func.func @transform_5(%arg0: i32) -> (i32, i32) {
    %c0_i32 = arith.constant 0 : i32
    %c0_i32_0 = arith.constant 0 : i32
    %c0_i32_1 = arith.constant 0 : i32
    return %c0_i32, %c0_i32_0 : i32, i32
  }
  func.func @transform_6(%arg0: i32) -> (i32, i32) {
    %c0_i32 = arith.constant 0 : i32
    %c0_i32_0 = arith.constant 0 : i32
    %c0_i32_1 = arith.constant 0 : i32
    return %c0_i32, %c0_i32_0 : i32, i32
  }
  func.func @transform_7(%arg0: i32) -> (i32, i32) {
    %c0_i32 = arith.constant 0 : i32
    %c0_i32_0 = arith.constant 0 : i32
    %c0_i32_1 = arith.constant 0 : i32
    return %c0_i32, %c0_i32_0 : i32, i32
  }
  func.func @transform_8(%arg0: i32) -> (i32, i32) {
    %c0_i32 = arith.constant 0 : i32
    %c0_i32_0 = arith.constant 0 : i32
    %c0_i32_1 = arith.constant 0 : i32
    return %c0_i32, %c0_i32_0 : i32, i32
  }
  func.func @transform_9(%arg0: i32) -> (i32, i32) {
    %c0_i32 = arith.constant 0 : i32
    %c0_i32_0 = arith.constant 0 : i32
    %c0_i32_1 = arith.constant 0 : i32
    return %c0_i32, %c0_i32_0 : i32, i32
  }
  func.func @transform_10(%arg0: i32) -> (i32, i32) {
    %c0_i32 = arith.constant 0 : i32
    %c0_i32_0 = arith.constant 0 : i32
    return %arg0, %c0_i32 : i32, i32
  }
}

module attributes {stable_mosaic.version = 11 : i64} {
  func.func @_lnf_fc_l2_kernel(%arg0: i32, %arg1: memref<2x128xbf16, #tpu.memory_space<vmem>>, %arg2: memref<1x128xf32, #tpu.memory_space<vmem>>, %arg3: memref<1x128xf32, #tpu.memory_space<vmem>>, %arg4: memref<128x128xbf16, #tpu.memory_space<vmem>>, %arg5: memref<1x128xf32, #tpu.memory_space<vmem>>, %arg6: memref<2x128xf32, #tpu.memory_space<vmem>>) attributes {dimension_semantics = [#tpu.dimension_semantics<arbitrary>], iteration_bounds = array<i64: 1>, scalar_prefetch = 0 : i64, scratch_operands = 0 : i64, tpu.core_type = #tpu.core_type<tc>, window_params = [{pipeline_mode = #tpu.pipeline_mode<synchronous>, transform_indices = @transform_0, window_bounds = array<i64: 2, 128>}, {pipeline_mode = #tpu.pipeline_mode<synchronous>, transform_indices = @transform_1, window_bounds = array<i64: 1, 128>}, {pipeline_mode = #tpu.pipeline_mode<synchronous>, transform_indices = @transform_2, window_bounds = array<i64: 1, 128>}, {pipeline_mode = #tpu.pipeline_mode<synchronous>, transform_indices = @transform_3, window_bounds = array<i64: 128, 128>}, {pipeline_mode = #tpu.pipeline_mode<synchronous>, transform_indices = @transform_4, window_bounds = array<i64: 1, 128>}, {pipeline_mode = #tpu.pipeline_mode<synchronous>, transform_indices = @transform_5, window_bounds = array<i64: 2, 128>}]} {
    %c0 = arith.constant 0 : index
    %c0_0 = arith.constant 0 : index
    %0 = vector.load %arg1[%c0, %c0_0] : memref<2x128xbf16, #tpu.memory_space<vmem>>, vector<2x128xbf16>
    %1 = arith.extf %0 : vector<2x128xbf16> to vector<2x128xf32>
    %cst = arith.constant dense<0.000000e+00> : vector<2xf32>
    %2 = vector.multi_reduction <add>, %1, %cst [1] : vector<2x128xf32> to vector<2xf32>
    %3 = vector.shape_cast %2 : vector<2xf32> to vector<2x1xf32>
    %cst_1 = arith.constant 1.280000e+02 : f32
    %4 = vector.broadcast %cst_1 : f32 to vector<2x1xf32>
    %5 = arith.divf %3, %4 : vector<2x1xf32>
    %6 = vector.broadcast %5 : vector<2x1xf32> to vector<2x128xf32>
    %7 = arith.subf %1, %6 : vector<2x128xf32>
    %8 = arith.mulf %7, %7 : vector<2x128xf32>
    %cst_2 = arith.constant dense<0.000000e+00> : vector<2xf32>
    %9 = vector.multi_reduction <add>, %8, %cst_2 [1] : vector<2x128xf32> to vector<2xf32>
    %10 = vector.shape_cast %9 : vector<2xf32> to vector<2x1xf32>
    %cst_3 = arith.constant 1.280000e+02 : f32
    %11 = vector.broadcast %cst_3 : f32 to vector<2x1xf32>
    %12 = arith.divf %10, %11 : vector<2x1xf32>
    %cst_4 = arith.constant 9.99999996E-13 : f32
    %13 = vector.broadcast %cst_4 : f32 to vector<2x1xf32>
    %14 = arith.addf %12, %13 : vector<2x1xf32>
    %15 = math.rsqrt %14 : vector<2x1xf32>
    %16 = vector.broadcast %15 : vector<2x1xf32> to vector<2x128xf32>
    %17 = arith.mulf %7, %16 : vector<2x128xf32>
    %c0_5 = arith.constant 0 : index
    %c0_6 = arith.constant 0 : index
    %18 = vector.load %arg2[%c0_5, %c0_6] : memref<1x128xf32, #tpu.memory_space<vmem>>, vector<1x128xf32>
    %19 = vector.broadcast %18 : vector<1x128xf32> to vector<2x128xf32>
    %20 = arith.mulf %17, %19 : vector<2x128xf32>
    %c0_7 = arith.constant 0 : index
    %c0_8 = arith.constant 0 : index
    %21 = vector.load %arg3[%c0_7, %c0_8] : memref<1x128xf32, #tpu.memory_space<vmem>>, vector<1x128xf32>
    %22 = vector.broadcast %21 : vector<1x128xf32> to vector<2x128xf32>
    %23 = arith.addf %20, %22 : vector<2x128xf32>
    %24 = arith.truncf %23 : vector<2x128xf32> to vector<2x128xbf16>
    %c0_9 = arith.constant 0 : index
    %c0_10 = arith.constant 0 : index
    %25 = vector.load %arg4[%c0_9, %c0_10] : memref<128x128xbf16, #tpu.memory_space<vmem>>, vector<128x128xbf16>
    %cst_11 = arith.constant dense<0.000000e+00> : vector<2x128xf32>
    %26 = tpu.matmul %24, %25, %cst_11 {dimension_numbers = #tpu.dot_dimension_numbers<[1], [0], [0], [1], [0, 0, 1, 1], [], []>} : vector<2x128xbf16>, vector<128x128xbf16>, vector<2x128xf32> -> vector<2x128xf32>
    %c0_12 = arith.constant 0 : index
    %c0_13 = arith.constant 0 : index
    %27 = vector.load %arg5[%c0_12, %c0_13] : memref<1x128xf32, #tpu.memory_space<vmem>>, vector<1x128xf32>
    %28 = vector.broadcast %27 : vector<1x128xf32> to vector<2x128xf32>
    %29 = arith.addf %26, %28 : vector<2x128xf32>
    %30 = arith.mulf %29, %29 : vector<2x128xf32>
    %cst_14 = arith.constant dense<0.000000e+00> : vector<2xf32>
    %31 = vector.multi_reduction <add>, %30, %cst_14 [1] : vector<2x128xf32> to vector<2xf32>
    %32 = vector.shape_cast %31 : vector<2xf32> to vector<2x1xf32>
    %cst_15 = arith.constant 1.000000e-24 : f32
    %33 = vector.broadcast %cst_15 : f32 to vector<2x1xf32>
    %34 = arith.maximumf %32, %33 : vector<2x1xf32>
    %35 = math.rsqrt %34 : vector<2x1xf32>
    %36 = vector.broadcast %35 : vector<2x1xf32> to vector<2x128xf32>
    %37 = arith.mulf %29, %36 : vector<2x128xf32>
    %c0_16 = arith.constant 0 : index
    %c0_17 = arith.constant 0 : index
    %38 = vector.load %arg6[%c0_16, %c0_17] : memref<2x128xf32, #tpu.memory_space<vmem>>, vector<2x128xf32>
    tpu.vector_store %arg6[%c0_16, %c0_17], %37 {strides = array<i32>} : memref<2x128xf32, #tpu.memory_space<vmem>>, vector<2x128xf32>,
    return
  }
  func.func @transform_0(%arg0: i32) -> (i32, i32) {
    %c0_i32 = arith.constant 0 : i32
    %c0_i32_0 = arith.constant 0 : i32
    %c0_i32_1 = arith.constant 0 : i32
    return %c0_i32, %c0_i32_0 : i32, i32
  }
  func.func @transform_1(%arg0: i32) -> (i32, i32) {
    %c0_i32 = arith.constant 0 : i32
    %c0_i32_0 = arith.constant 0 : i32
    %c0_i32_1 = arith.constant 0 : i32
    return %c0_i32, %c0_i32_0 : i32, i32
  }
  func.func @transform_2(%arg0: i32) -> (i32, i32) {
    %c0_i32 = arith.constant 0 : i32
    %c0_i32_0 = arith.constant 0 : i32
    %c0_i32_1 = arith.constant 0 : i32
    return %c0_i32, %c0_i32_0 : i32, i32
  }
  func.func @transform_3(%arg0: i32) -> (i32, i32) {
    %c0_i32 = arith.constant 0 : i32
    %c0_i32_0 = arith.constant 0 : i32
    %c0_i32_1 = arith.constant 0 : i32
    return %c0_i32, %c0_i32_0 : i32, i32
  }
  func.func @transform_4(%arg0: i32) -> (i32, i32) {
    %c0_i32 = arith.constant 0 : i32
    %c0_i32_0 = arith.constant 0 : i32
    %c0_i32_1 = arith.constant 0 : i32
    return %c0_i32, %c0_i32_0 : i32, i32
  }
  func.func @transform_5(%arg0: i32) -> (i32, i32) {
    %c0_i32 = arith.constant 0 : i32
    %c0_i32_0 = arith.constant 0 : i32
    %c0_i32_1 = arith.constant 0 : i32
    return %c0_i32, %c0_i32_0 : i32, i32
  }
}

</mosaic_0001>

<bundles_post_ra>
// kernel: _lambda_.8
= control target key start
LH: loop header
LB: loop body
LE: loop exit
PB: predicated region body
PF: predicated region fallthrough
CT: control target
= control target key end

     0   :  { %s554_s18 = smov 0   ;;  %s626_s0 = inlined_call_operand.vmem [shape: f32[2,4,192], index: 0, kind: input, shape index: {}]   ;;  %s627_s1 = inlined_call_operand.vmem [shape: bf16[192,128], index: 1, kind: input, shape index: {}]   ;;  %s628_s2 = inlined_call_operand.vmem [shape: f32[1,128], index: 2, kind: input, shape index: {}]   ;;  %s629_s3 = inlined_call_operand.vmem [shape: f32[1,128], index: 3, kind: input, shape index: {}]   ;;  %s630_s4 = inlined_call_operand.vmem [shape: f32[16,128], index: 4, kind: input, shape index: {}]   ;;  %s631_s5 = inlined_call_operand.vmem [shape: bf16[2,16,128], index: 5, kind: output, shape index: {}]  }
   0x1 LB: > { %s455_s19 = sadd.s32 4294967295, %s520_s18   ;;  %p459_p0 = scmp.ge.s32.totalorder %s520_s18, 1  ;;  %s520_s18 = sphi %s554_s18, %s15_s18  }
   0x2   : > { %p187_p1 = scmp.lt.s32.totalorder %s520_s18, 3 }
   0x4   : > { %p188_p2 = pnand %p459_p0, %p187_p1 }
   0x5   : > { %v501_v0 = vld [vmem:[%s627_s1] sm:$0xff] (!%p188_p2)   ;;  %v522_v1 = vmov (!%p188_p2), 0   ;;  %p215_p3 = scmp.lt.s32.totalorder (!%p188_p2), %s455_s19, 1  ;;  %v502_v2 = vld [vmem:[%s627_s1 + $0x8] sm:$0xff] (!%p188_p2)   ;;  %v503_v3 = vld [vmem:[%s627_s1 + $0x10] sm:$0xff] (!%p188_p2)   ;;  %vm335_vm0 = vcmask (!%p188_p2), 523264  }
   0x6   : > { %191 = sbr.rel (%p188_p2) target bundleno = 281 (0x119), region = 40  ;;  %339 = vmatprep.subr.bf16.mxu0 (!%p188_p2), %v522_v1  ;;  %v504_v4 = vld [vmem:[%s627_s1 + $0x18] sm:$0xff] (!%p188_p2)   ;;  %v505_v7 = vld [vmem:[%s627_s1 + $0x20] sm:$0xff] (!%p188_p2)   ;;  %v506_v9 = vld [vmem:[%s627_s1 + $0x28] sm:$0xff] (!%p188_p2)   ;;  %v523_v19 = vmov (!%p188_p2), 0.0  }
   0x7   : > { %340 = vmatpush1.bf16.msra.mxu0 (!%p188_p2), %v501_v0  ;;  %v507_v10 = vld [vmem:[%s627_s1 + $0x30] sm:$0xff] (!%p188_p2)   ;;  %v508_v11 = vld [vmem:[%s627_s1 + $0x38] sm:$0xff] (!%p188_p2)   ;;  %v509_v12 = vld [vmem:[%s627_s1 + $0x40] sm:$0xff] (!%p188_p2)   ;;  %379 = vst [vmem:[#allocation2] sm:$0xff] (!%p188_p2), %v523_v19 }
   0x8   : > { %341 = vmatprep.subr.bf16.mxu0 (!%p188_p2), %v522_v1  ;;  %v510_v13 = vld [vmem:[%s627_s1 + $0x48] sm:$0xff] (!%p188_p2)   ;;  %v511_v14 = vld [vmem:[%s627_s1 + $0x50] sm:$0xff] (!%p188_p2)   ;;  %v512_v15 = vld [vmem:[%s627_s1 + $0x58] sm:$0xff] (!%p188_p2)  }
   0x9   : > { %v381_v17 = vld [vmem:[%s629_s3] sm:$0x1] (!%p188_p2)  ;;  %v385_v23 = vld [vmem:[%s630_s4 + $0x1] sm:$0xf] (!%p188_p2) }
   0xa   : > { %v382_v18 = vld [vmem:[%s630_s4] sm:$0x1] (!%p188_p2) }
   0xb   : > { %342 = vmatpush1.bf16.msra.mxu0 (!%p188_p2), %v502_v2  ;;  %v383_v20 = vadd.f32 (!%p188_p2), %v382_v18, %v381_v17  ;;  %v464_v21 = vld [vmem:[%s628_s2] ss:$0 sm:$0xff] (!%p188_p2) }
   0xc   : > { %343 = vmatprep.subr.bf16.mxu0 (!%p188_p2), %v522_v1 }
   0xd   : > { %s633_s19 = smov (!%p215_p3, %s455_s19), 1  ;;  %384 = vst [vmem:[#allocation2] sm:$0x1] %v383_v20 }
   0xe   : > { %s482_s26 = sshll.u32 %s633_s19, 3 }
   0xf   : > { %s219_s29 = scalar_lea.vmem %s626_s0, %s482_s26  ;;  %344 = vmatpush1.bf16.msra.mxu0 %v503_v3  ;;  %s224_s11 = scalar_lea.vmem %s631_s5, %s482_s26 }
  0x10   : > { %345 = vmatprep.subr.bf16.mxu0 %v522_v1  ;;  %v226_v5 = vld [vmem:[%s219_s29] sm:$0xff] }
  0x11   : > { %v228_v6 = vcombine.high %v226_v5, %v226_v5  ;;  %v230_v16 = vpack.c.bf16 %v226_v5, %v226_v5 }
  0x13   : > { %346 = vmatpush1.bf16.msra.mxu0 %v504_v4  ;;  %v231_v8 = vpack.c.bf16 %v228_v6, %v228_v6 }
  0x14   : > { %347 = vmatprep.subr.bf16.mxu0 %v522_v1 }
  0x15   : > { %477 = vmatprep.mubr.msk.bf16.mxu0 %vm335_vm0, %v231_v8 }
  0x17   : > { %348 = vmatpush1.bf16.msra.mxu0 %v505_v7 }
  0x18   : > { %349 = vmatprep.subr.bf16.mxu0 %v522_v1 }
  0x1b   : > { %350 = vmatpush1.bf16.msra.mxu0 %v506_v9 }
  0x1c   : > { %351 = vmatprep.subr.bf16.mxu0 %v522_v1 }
  0x1f   : > { %352 = vmatpush1.bf16.msra.mxu0 %v507_v10 }
  0x20   : > { %353 = vmatprep.subr.bf16.mxu0 %v522_v1 }
  0x23   : > { %354 = vmatpush1.bf16.msra.mxu0 %v508_v11 }
  0x24   : > { %355 = vmatprep.subr.bf16.mxu0 %v522_v1 }
  0x27   : > { %356 = vmatpush1.bf16.msra.mxu0 %v509_v12 }
  0x28   : > { %357 = vmatprep.subr.bf16.mxu0 %v522_v1 }
  0x2b   : > { %358 = vmatpush1.bf16.msra.mxu0 %v510_v13 }
  0x2c   : > { %359 = vmatprep.subr.bf16.mxu0 %v522_v1 }
  0x2f   : > { %360 = vmatpush1.bf16.msra.mxu0 %v511_v14 }
  0x30   : > { %361 = vmatprep.subr.bf16.mxu0 %v522_v1 }
  0x33   : > { %362 = vmatpush1.bf16.msra.mxu0 %v512_v15 }
  0x36   : > { %372 = vmatmul.mubr.bf16.vlgmr.msra.gmra.mrb[0].mxu0 %v230_v16 }
 0x109   : > { %v373_v22 = vpop.f32.mrb[0].mxu0 }
 0x10a   : > { %v374_v24 = vadd.f32 %v464_v21, %v373_v22  ;;  %v375_v25 = vpop.f32.mrb[1].mxu0 }
 0x10b   : > { %v376_v26 = vpop.f32.mrb[2].mxu0 }
 0x10c   : > { %v386_v27 = vadd.f32 %v385_v23, %v374_v24  ;;  %v377_v28 = vpop.f32.mrb[3].mxu0 }
 0x10e   : > { %387 = vst [vmem:[#allocation2 + $0x1] sm:$0xf] %v386_v27 }
 0x115   : > { %v388_v29 = vld [vmem:[#allocation2] sm:$0xff] }
 0x116   : > { %v489_v30 = vpack.c.bf16 %v523_v19, %v388_v29 }
 0x118   : > { %490 = vst [vmem:[%s224_s11] sm:$0xff] %v489_v30  }
 0x119 PF: > { %s15_s18 = sadd.s32 1, %s520_s18  }
 0x11a   : > { %p12_p4 = scmp.ge.s32.totalorder %s15_s18, 4  }
 0x11c   :  { %14 = sbr.rel (!%p12_p4) target bundleno = 1 (0x1), region = 70 }

// kernel: _lambda_.9
= control target key start
LH: loop header
LB: loop body
LE: loop exit
PB: predicated region body
PF: predicated region fallthrough
CT: control target
= control target key end

     0   :  { %v551_v41 = vmov 0   ;;  %s713_s0 = inlined_call_operand.vmem [shape: bf16[32,128], index: 0, kind: input, shape index: {}]   ;;  %s714_s3 = inlined_call_operand.vmem [shape: bf16[128,384], index: 3, kind: input, shape index: {}]   ;;  %s715_s1 = inlined_call_operand.vmem [shape: f32[1,128], index: 1, kind: input, shape index: {}]   ;;  %s716_s2 = inlined_call_operand.vmem [shape: f32[1,128], index: 2, kind: input, shape index: {}]   ;;  %s717_s4 = inlined_call_operand.vmem [shape: f32[1,384], index: 4, kind: input, shape index: {}]   ;;  %s718_s5 = inlined_call_operand.vmem [shape: bf16[32,384], index: 5, kind: output, shape index: {}]  }
   0x1   :  { %v472_v0 = vld [vmem:[%s713_s0] sm:$0xff]   ;;  %v479_v1 = vld [vmem:[%s713_s0 + $0x8] sm:$0xff]   ;;  %v521_v29 = vld [vmem:[%s714_s3 + $0x30] ss:$12 sps:$4 sm:$0xff]   ;;  %307 = vmatprep.mubr.bf16.mxu0 %v551_v41 }
   0x2   :  { %v473_v2 = vunpack.c.l.bf16 %v472_v0  ;;  %v477_v3 = vunpack.c.l.bf16 %v479_v1  ;;  %v474_v4 = vunpack.c.h.bf16 %v472_v0  ;;  %v478_v5 = vunpack.c.h.bf16 %v479_v1  ;;  %v511_v6 = vld [vmem:[%s714_s3 + $0x4] ss:$12 sps:$4 sm:$0xff]   ;;  %v513_v7 = vld [vmem:[%s714_s3] ss:$12 sps:$4 sm:$0xff]   ;;  %v514_v8 = vld [vmem:[%s714_s3 + $0x1c] ss:$12 sps:$4 sm:$0xff]  }
   0x3   :  { %275 = vmatprep.subr.bf16.mxu0 %v511_v6  ;;  %v516_v9 = vld [vmem:[%s714_s3 + $0x8] ss:$12 sps:$4 sm:$0xff]   ;;  %v517_v26 = vld [vmem:[%s714_s3 + $0x18] ss:$12 sps:$4 sm:$0xff]   ;;  %v520_v28 = vld [vmem:[%s714_s3 + $0x20] ss:$12 sps:$4 sm:$0xff]  }
   0x4   :  { %29 = vadd.xlane.f32.xlu0 %v473_v2  ;;  %33 = vadd.xlane.f32.xlu1 %v477_v3  ;;  %v518_v27 = vld [vmem:[%s714_s3 + $0x34] ss:$12 sps:$4 sm:$0xff]   ;;  %v522_v30 = vld [vmem:[%s714_s3 + $0x4c] ss:$12 sps:$4 sm:$0xff]   ;;  %v526_v33 = vld [vmem:[%s714_s3 + $0x64] ss:$12 sps:$4 sm:$0xff]  }
   0x5   :  { %276 = vmatpush1.bf16.msra.mxu0 %v513_v7  ;;  %490 = vmatprep.subr.bf16.mxu1 %v516_v9  ;;  %v524_v31 = vld [vmem:[%s714_s3 + $0x38] ss:$12 sps:$4 sm:$0xff]   ;;  %v525_v32 = vld [vmem:[%s714_s3 + $0x48] ss:$12 sps:$4 sm:$0xff]   ;;  %v528_v34 = vld [vmem:[%s714_s3 + $0x50] ss:$12 sps:$4 sm:$0xff]  }
   0x6   :  { %277 = vmatprep.subr.bf16.mxu0 %v514_v8  ;;  %491 = vmatpush3.bf16.msra.mxu1 %v516_v9  ;;  %v529_v35 = vld [vmem:[%s714_s3 + $0x60] ss:$12 sps:$4 sm:$0xff]   ;;  %v530_v36 = vld [vmem:[%s714_s3 + $0x7c] ss:$12 sps:$4 sm:$0xff]   ;;  %v533_v38 = vld [vmem:[%s714_s3 + $0x78] ss:$12 sps:$4 sm:$0xff]  }
   0x7   :  { %492 = vmatprep.subr.bf16.mxu1 %v520_v28  ;;  %v532_v37 = vld [vmem:[%s714_s3 + $0x68] ss:$12 sps:$4 sm:$0xff]   ;;  %v536_v40 = vld [vmem:[%s714_s3 + $0x80] ss:$12 sps:$4 sm:$0xff]   ;;  %v537_v42 = vld [vmem:[%s714_s3 + $0x90] ss:$12 sps:$4 sm:$0xff]  }
   0x8   :  { %31 = vadd.xlane.f32.xlu0 %v474_v4  ;;  %35 = vadd.xlane.f32.xlu1 %v478_v5  ;;  %v534_v39 = vld [vmem:[%s714_s3 + $0x94] ss:$12 sps:$4 sm:$0xff]   ;;  %v538_v43 = vld [vmem:[%s714_s3 + $0xac] ss:$12 sps:$4 sm:$0xff]   ;;  %v542_v46 = vld [vmem:[%s714_s3 + $0xb0] ss:$12 sps:$4 sm:$0xff]  }
   0x9   :  { %278 = vmatpush1.bf16.msra.mxu0 %v517_v26  ;;  %v540_v44 = vld [vmem:[%s714_s3 + $0x98] ss:$12 sps:$4 sm:$0xff]   ;;  %v541_v45 = vld [vmem:[%s714_s3 + $0xa8] ss:$12 sps:$4 sm:$0xff]   ;;  %v429_v61 = vld [vmem:[%s715_s1] ss:$0 sm:$0xff] }
   0xa   :  { %279 = vmatprep.subr.bf16.mxu0 %v518_v27  ;;  %493 = vmatpush3.bf16.msra.mxu1 %v520_v28 }
   0xb   :  { %494 = vmatprep.subr.bf16.mxu1 %v524_v31 }
   0xd   :  { %280 = vmatpush1.bf16.msra.mxu0 %v521_v29 }
   0xe   :  { %281 = vmatprep.subr.bf16.mxu0 %v522_v30  ;;  %495 = vmatpush3.bf16.msra.mxu1 %v524_v31 }
   0xf   :  { %496 = vmatprep.subr.bf16.mxu1 %v528_v34 }
  0x11   :  { %282 = vmatpush1.bf16.msra.mxu0 %v525_v32 }
  0x12   :  { %283 = vmatprep.subr.bf16.mxu0 %v526_v33  ;;  %497 = vmatpush3.bf16.msra.mxu1 %v528_v34 }
  0x13   :  { %498 = vmatprep.subr.bf16.mxu1 %v532_v37 }
  0x15   :  { %284 = vmatpush1.bf16.msra.mxu0 %v529_v35 }
  0x16   :  { %285 = vmatprep.subr.bf16.mxu0 %v530_v36  ;;  %499 = vmatpush3.bf16.msra.mxu1 %v532_v37 }
  0x17   :  { %500 = vmatprep.subr.bf16.mxu1 %v536_v40 }
  0x19   :  { %286 = vmatpush1.bf16.msra.mxu0 %v533_v38 }
  0x1a   :  { %287 = vmatprep.subr.bf16.mxu0 %v534_v39  ;;  %501 = vmatpush3.bf16.msra.mxu1 %v536_v40 }
  0x1b   :  { %502 = vmatprep.subr.bf16.mxu1 %v540_v44 }
  0x1d   :  { %288 = vmatpush1.bf16.msra.mxu0 %v537_v42 }
  0x1e   :  { %289 = vmatprep.subr.bf16.mxu0 %v538_v43  ;;  %503 = vmatpush3.bf16.msra.mxu1 %v540_v44 }
  0x1f   :  { %504 = vmatprep.subr.bf16.mxu1 %v542_v46 }
  0x21   :  { %290 = vmatpush1.bf16.msra.mxu0 %v541_v45 }
  0x22   :  { %505 = vmatpush3.bf16.msra.mxu1 %v542_v46 }
  0x91   :  { %v30_v10 = vpop.xlane.xlu0 %29  ;;  %v34_v11 = vpop.xlane.xlu1 %33 }
  0x92   :  { %v38_v12 = vmul.f32 0.0078125, %v30_v10  ;;  %v40_v13 = vmul.f32 0.0078125, %v34_v11 }
  0x94   :  { %v600_v14 = vsub.f32 %v473_v2, %v38_v12  ;;  %v602_v15 = vsub.f32 %v477_v3, %v40_v13  ;;  %v430_v2 = vld [vmem:[%s716_s2] ss:$0 sm:$0xff] }
  0x95   :  { %v32_v16 = vpop.xlane.xlu0 %31  ;;  %v36_v17 = vpop.xlane.xlu1 %35 }
  0x96   :  { %v39_v18 = vmul.f32 0.0078125, %v32_v16  ;;  %v46_v19 = vmul.f32 %v600_v14, %v600_v14  ;;  %v41_v20 = vmul.f32 0.0078125, %v36_v17  ;;  %v48_v23 = vmul.f32 %v602_v15, %v602_v15 }
  0x97   :  { %v132_v16 = vlaneseq }
  0x98   :  { %v606_v21 = vsub.f32 %v474_v4, %v39_v18  ;;  %50 = vadd.xlane.f32.xlu0 %v46_v19  ;;  %v608_v22 = vsub.f32 %v478_v5, %v41_v20  ;;  %v130_v18 = vld [vmem:[%s717_s4] sm:$0x7] }
  0x99   :  { %v133_v17 = vshrl.u32 %v132_v16, 7 }
  0x9a   :  { %v47_v24 = vmul.f32 %v606_v21, %v606_v21  ;;  %v49_v25 = vmul.f32 %v608_v22, %v608_v22 }
  0x9b   :  { %v138_v19 = vsub.s32 1, %v133_v17 }
  0x9c   :  { %54 = vadd.xlane.f32.xlu0 %v48_v23  ;;  %52 = vadd.xlane.f32.xlu1 %v47_v24 }
  0xa0   :  { %56 = vadd.xlane.f32.xlu1 %v49_v25 }
 0x125   :  { %v51_v47 = vpop.xlane.xlu0 %50 }
 0x126   :  { %v58_v48 = vmul.f32 0.0078125, %v51_v47 }
 0x128   :  { %v62_v49 = vadd.f32 1e-12, %v58_v48 }
 0x129   :  { %v53_v50 = vpop.xlane.xlu1 %52  ;;  %v55_v51 = vpop.xlane.xlu0 %54 }
 0x12a   :  { %543 = vrsqrt.f32 %v62_v49  ;;  %v59_v52 = vmul.f32 0.0078125, %v53_v50  ;;  %v60_v53 = vmul.f32 0.0078125, %v55_v51 }
 0x12c   :  { %v63_v54 = vadd.f32 1e-12, %v59_v52  ;;  %v64_v55 = vadd.f32 1e-12, %v60_v53 }
 0x12d   :  { %v57_v56 = vpop.xlane.xlu1 %56 }
 0x12e   :  { %545 = vrsqrt.f32 %v63_v54  ;;  %v61_v57 = vmul.f32 0.0078125, %v57_v56 }
 0x12f   :  { %547 = vrsqrt.f32 %v64_v55 }
 0x130   :  { %v65_v58 = vadd.f32 1e-12, %v61_v57 }
 0x132   :  { %549 = vrsqrt.f32 %v65_v58 }
 0x134   :  { %v544_v59 = vpop.eup %543 }
 0x135   :  { %v70_v60 = vmul.f32 %v544_v59, %v600_v14 }
 0x137   :  { %v81_v1 = vmul.f32 %v429_v61, %v70_v60 }
 0x138   :  { %v546_v62 = vpop.eup %545 }
 0x139   :  { %v548_v63 = vpop.eup %547  ;;  %v71_v0 = vmul.f32 %v546_v62, %v606_v21  ;;  %v92_v6 = vadd.f32 %v430_v2, %v81_v1  ;;  %v142_v21 = vsub.s32 2, %v133_v17 }
 0x13a   :  { %v72_v3 = vmul.f32 %v548_v63, %v602_v15  ;;  %v134_v15 = vsub.s32 0, %v133_v17 }
 0x13b   :  { %v82_v4 = vmul.f32 %v429_v61, %v71_v0  ;;  %v143_v26 = vrot.slane %v130_v18, %v142_v21 }
 0x13c   :  { %v550_v5 = vpop.eup %549  ;;  %v83_v9 = vmul.f32 %v429_v61, %v72_v3  ;;  %v135_v20 = vrot.slane %v130_v18, %v134_v15 }
 0x13d   :  { %v93_v7 = vadd.f32 %v430_v2, %v82_v4  ;;  %v73_v8 = vmul.f32 %v550_v5, %v608_v22  ;;  %v139_v22 = vrot.slane %v130_v18, %v138_v19 }
 0x13e   :  { %v94_v12 = vadd.f32 %v430_v2, %v83_v9 }
 0x13f   :  { %v96_v10 = vpack.c.bf16 %v93_v7, %v92_v6  ;;  %v84_v11 = vmul.f32 %v429_v61, %v73_v8 }
 0x141   :  { %308 = vmatmul.mubr.bf16.vlgmr.msra.gmra.mrb[0].mxu0 %v96_v10  ;;  %506 = vmatprep.mubr.bf16.mxu1 %v96_v10  ;;  %v95_v13 = vadd.f32 %v430_v2, %v84_v11 }
 0x142   :  { %317 = vmatprep.mubr.bf16.mxu0 %v551_v41 }
 0x143   :  { %v97_v14 = vpack.c.bf16 %v95_v13, %v94_v12 }
 0x145   :  { %507 = vmatmul.mubr.bf16.vlgmr.msra.gmra.mrb[0].mxu1 %v97_v14 }
 0x149   :  { %318 = vmatmul.mubr.bf16.gmra.mrb[4].mxu0 %v97_v14 }
 0x214   :  { %v309_v23 = vpop.f32.mrb[0].mxu0 }
 0x215   :  { %v310_v24 = vadd.f32 %v309_v23, %v135_v20  ;;  %v311_v25 = vpop.f32.mrb[1].mxu0 }
 0x216   :  { %v312_v27 = vadd.f32 %v311_v25, %v139_v22  ;;  %v313_v28 = vpop.f32.mrb[2].mxu0 }
 0x217   :  { %v314_v29 = vadd.f32 %v313_v28, %v135_v20  ;;  %v315_v30 = vpop.f32.mrb[3].mxu0 }
 0x218   :  { %v463_v31 = vpack.c.bf16 %v312_v27, %v310_v24  ;;  %v316_v32 = vadd.f32 %v315_v30, %v139_v22  ;;  %v508_v33 = vpop.f32.mrb[0].mxu1 }
 0x219   :  { %v371_v34 = vadd.f32 %v508_v33, %v143_v26  ;;  %v362_v35 = vpop.f32.mrb[1].mxu1 }
 0x21a   :  { %417 = vst [vmem:[%s718_s5] sm:$0xff] %v463_v31  ;;  %v465_v36 = vpack.c.bf16 %v316_v32, %v314_v29  ;;  %v363_v37 = vadd.f32 %v362_v35, %v143_v26  ;;  %v509_v38 = vpop.f32.mrb[2].mxu1 }
 0x21b   :  { %v468_v39 = vpack.c.bf16 %v371_v34, %v371_v34  ;;  %v374_v40 = vadd.f32 %v509_v38, %v143_v26  ;;  %v365_v41 = vpop.f32.mrb[3].mxu1 }
 0x21c   :  { %419 = vst [vmem:[%s718_s5 + $0xc] sm:$0xff] %v465_v36  ;;  %v464_v42 = vpack.c.bf16 %v363_v37, %v363_v37  ;;  %v366_v43 = vadd.f32 %v365_v41, %v143_v26  ;;  %v319_v44 = vpop.f32.mrb[4].mxu0 }
 0x21d   :  { %422 = vst [vmem:[%s718_s5 + $0x20] sm:$0xf] %v468_v39  ;;  %v470_v45 = vpack.c.bf16 %v374_v40, %v374_v40  ;;  %v320_v46 = vadd.f32 %v319_v44, %v135_v20  ;;  %v321_v47 = vpop.f32.mrb[5].mxu0 }
 0x21e   :  { %418 = vst [vmem:[%s718_s5 + $0x8] sm:$0xf] %v464_v42  ;;  %v466_v48 = vpack.c.bf16 %v366_v43, %v366_v43  ;;  %v322_v49 = vadd.f32 %v321_v47, %v139_v22  ;;  %v323_v50 = vpop.f32.mrb[6].mxu0 }
 0x21f   :  { %424 = vst [vmem:[%s718_s5 + $0x2c] sm:$0xf] %v470_v45  ;;  %v324_v51 = vadd.f32 %v323_v50, %v135_v20  ;;  %v325_v52 = vpop.f32.mrb[7].mxu0 }
 0x220   :  { %420 = vst [vmem:[%s718_s5 + $0x14] sm:$0xf] %v466_v48  ;;  %v467_v53 = vpack.c.bf16 %v322_v49, %v320_v46  ;;  %v326_v54 = vadd.f32 %v325_v52, %v139_v22 }
 0x222   :  { %421 = vst [vmem:[%s718_s5 + $0x18] sm:$0xff] %v467_v53  ;;  %v469_v55 = vpack.c.bf16 %v326_v54, %v324_v51 }
 0x224   :  { %423 = vst [vmem:[%s718_s5 + $0x24] sm:$0xff] %v469_v55 }

// kernel: _lambda_.10
= control target key start
LH: loop header
LB: loop body
LE: loop exit
PB: predicated region body
PF: predicated region fallthrough
CT: control target
= control target key end

     0   :  { %s1010_s12 = smov 0   ;;  %s1012_s13 = smov 0   ;;  %s1136_s0 = inlined_call_operand.vmem [shape: bf16[32,384], index: 0, kind: input, shape index: {}, may-alias: {0,1,2}]   ;;  %s1137_s1 = inlined_call_operand.vmem [shape: bf16[32,384], index: 1, kind: input, shape index: {}, may-alias: {0,1,2}]   ;;  %s1138_s2 = inlined_call_operand.vmem [shape: bf16[32,384], index: 2, kind: input, shape index: {}, may-alias: {0,1,2}]   ;;  %s1139_s3 = inlined_call_operand.vmem [shape: bf16[32,128], index: 3, kind: output, shape index: {}]  }
   0x1   :  { %s1014_s14 = smov 0   ;;  %s1016_s15 = smov 0  }
   0x2   :  { %s1018_s16 = smov 0  }
   0x3 LB: > { %s25_s17 = sadd.s32 1, %s981_s15  ;;  %p41_p1 = scmp.ne.s32.totalorder %s973_s13, %s969_s12  ;;  %s985_s16 = sphi %s1018_s16, %s13_s16   ;;  %s981_s15 = sphi %s1016_s15, %s1144_s15   ;;  %s977_s14 = sphi %s1014_s14, %s1143_s14   ;;  %s973_s13 = sphi %s1012_s13, %s1142_s13   ;;  %s969_s12 = sphi %s1010_s12, %s1141_s12  }
   0x4   : > { %p27_p0 = scmp.ge.s32.totalorder %s25_s17, 2  ;;  %p42_p2 = scmp.eq.s32.totalorder %s985_s16, 0 }
   0x5   : > { %s34_s20 = sadd.s32 1, %s973_s13  ;;  %p811_p5 = scmp.ge.s32.totalorder %s985_s16, 2 }
   0x6   : > { %s1146_s17 = smov (%p27_p0, %s25_s17), 0  ;;  %p1041_p3 = por %p42_p2, %p41_p1 }
   0x7   : > { %s29_s19 = ssub.s32 %s981_s15, %s1146_s17  ;;  %155 = sbr.rel (%p811_p5) target bundleno = 35 (0x23), region = 16 }
   0x8   : > { %p32_p4 = scmp.eq.s32.totalorder %s29_s19, 0 }
   0xa   : > { %s1049_s21 = scalar_select %p32_p4, %s973_s13, %s34_s20  }
   0xe   : > { %158 = sbr.rel (!%p1041_p3) target bundleno = 21 (0x15), region = 20  ;;  %s160_s22 = sand.u32 (%p1041_p3), 1, %s973_s13  }
   0xf   : > { %s880_s23 = smul.u32 (%p1041_p3), 24, %s981_s15  ;;  %s812_s24 = sshll.u32 (%p1041_p3), %s160_s22, 3 }
  0x10   : > { %s162_s28 = scalar_lea.vmem (%p1041_p3), [#allocation2], %s812_s24 }
  0x11   : > { %s167_s27 = scalar_lea.vmem (%p1041_p3), %s1136_s0, %s880_s23 }
  0x12   : > { %v183_v0 = vld [vmem:[%s167_s27] sm:$0xf] (%p1041_p3)  ;;  %v185_v1 = vld [vmem:[%s167_s27 + $0xc] sm:$0xf] (%p1041_p3) }
  0x13   : > { %184 = vst [vmem:[%s162_s28] sm:$0xf] (%p1041_p3), %v183_v0  ;;  %186 = vst [vmem:[%s162_s28 + $0x4] sm:$0xf] (%p1041_p3), %v185_v1 }
  0x15 PF: > { %213 = sbr.rel (!%p1041_p3) target bundleno = 28 (0x1c), region = 61  ;;  %s215_s29 = sand.u32 (%p1041_p3), 1, %s973_s13  }
  0x16   : > { %s817_s30 = smul.u32 (%p1041_p3), 24, %s981_s15  ;;  %s816_s4 = sshll.u32 (%p1041_p3), %s215_s29, 3 }
  0x17   : > { %s217_s8 = scalar_lea.vmem (%p1041_p3), [#allocation3], %s816_s4 }
  0x18   : > { %s722_s7 = scalar_lea.vmem (%p1041_p3), %s1137_s1, %s817_s30 }
  0x19   : > { %v818_v2 = vld [vmem:[%s722_s7 + $0x4] sm:$0xf] (%p1041_p3)  ;;  %v819_v3 = vld [vmem:[%s722_s7 + $0x10] sm:$0xf] (%p1041_p3) }
  0x1a   : > { %240 = vst [vmem:[%s217_s8] sm:$0xf] (%p1041_p3), %v818_v2  ;;  %242 = vst [vmem:[%s217_s8 + $0x4] sm:$0xf] (%p1041_p3), %v819_v3 }
  0x1c PF: > { %269 = sbr.rel (!%p1041_p3) target bundleno = 35 (0x23), region = 102  ;;  %s271_s9 = sand.u32 (%p1041_p3), 1, %s973_s13  }
  0x1d   : > { %s821_s10 = smul.u32 (%p1041_p3), 24, %s981_s15  ;;  %s820_s11 = sshll.u32 (%p1041_p3), %s271_s9, 3 }
  0x1e   : > { %s273_s23 = scalar_lea.vmem (%p1041_p3), [#allocation4], %s820_s11 }
  0x1f   : > { %s729_s22 = scalar_lea.vmem (%p1041_p3), %s1138_s2, %s821_s10 }
  0x20   : > { %v822_v4 = vld [vmem:[%s729_s22 + $0x8] sm:$0xf] (%p1041_p3)  ;;  %v823_v5 = vld [vmem:[%s729_s22 + $0x14] sm:$0xf] (%p1041_p3) }
  0x21   : > { %296 = vst [vmem:[%s273_s23] sm:$0xf] (%p1041_p3), %v822_v4  ;;  %298 = vst [vmem:[%s273_s23 + $0x4] sm:$0xf] (%p1041_p3), %v823_v5 }
  0x23 PF: > { %p824_p6 = scmp.ge.s32.totalorder %s985_s16, 1  ;;  %p324_p7 = scmp.lt.s32.totalorder %s985_s16, 3 }
  0x25   : > { %p325_p8 = pnand %p824_p6, %p324_p7 }
  0x26   : > { %s331_s18 = sand.u32 (!%p325_p8), 1, %s969_s12   ;;  %v987_v6 = vmov (!%p325_p8), 0.0   ;;  %vm988_vm0 = vmmov (!%p325_p8), 0   ;;  %vm416_vm1 = vcmask (!%p325_p8), 523264   ;;  %v395_v14 = vlaneseq (!%p325_p8)  ;;  %s989_s26 = smov (!%p325_p8), 64  }
  0x27   : > { %328 = sbr.rel (%p325_p8) target bundleno = 1459 (0x5b3), region = 143  ;;  %856 = vmatprep.subr.bf16.mxu0 (!%p325_p8), %v987_v6  ;;  %s1077_s24 = sshll.u32 (!%p325_p8), %s331_s18, 3  ;;  %858 = vmatprep.mubr.msk.bf16.mxu0 (!%p325_p8), %vm988_vm0, %v987_v6  ;;  %vm466_vm3 = vcmask (!%p325_p8), 130048  }
  0x28   : > { %862 = vmatprep.subr.bf16.mxu1 (!%p325_p8), %v987_v6  ;;  %864 = vmatprep.mubr.msk.bf16.mxu1 (!%p325_p8), %vm988_vm0, %v987_v6  ;;  %s340_s25 = scalar_lea.vmem (!%p325_p8), [#allocation3], %s1077_s24  ;;  %s333_s12 = scalar_lea.vmem (!%p325_p8), [#allocation2], %s1077_s24  ;;  %v396_v15 = vand.u32 (!%p325_p8), 127, %v395_v14 }
  0x29   : > { %v929_v7 = vld [vmem:[%s340_s25] sm:$0xff] (!%p325_p8)   ;;  %v398_v8 = vld [vmem:[%s333_s12] sm:$0xf] (!%p325_p8)  ;;  %v399_v9 = vld [vmem:[%s333_s12 + $0x4] sm:$0xf] (!%p325_p8)  ;;  %s347_s27 = scalar_lea.vmem (!%p325_p8), [#allocation4], %s1077_s24 }
  0x2a   : > { %v421_v10 = vsel (!%p325_p8), %vm416_vm1, %v929_v7, 0  ;;  %v400_v11 = vmul.bf16 (!%p325_p8), 1040203264, %v398_v8  ;;  %v401_v12 = vmul.bf16 (!%p325_p8), 1040203264, %v399_v9  ;;  %vm397_vm2 = vcmp.lt.s32.totalorder (!%p325_p8), %v396_v15, 5 }
  0x2b   : > { %857 = vmatpush3.bf16.xpose.msra.mxu0 (!%p325_p8), %v421_v10  ;;  %v930_v34 = vld [vmem:[%s347_s27] sm:$0xff] (!%p325_p8)   ;;  %s828_s28 = sshll.u32 (!%p325_p8), %s977_s14, 1 }
  0x2c   : > { %874 = vmatprep.subr.bf16.mxu0 (!%p325_p8), %v987_v6  ;;  %v830_v13 = vcombine.low (!%p325_p8), %v400_v11, %v401_v12  ;;  %863 = vmatpush3.bf16.msra.mxu1 (!%p325_p8), %v930_v34  ;;  %p385_p9 = scmp.lt.s32.totalorder (!%p325_p8), %s828_s28, 3 }
  0x2d   : > { %868 = vmatprep.subr.bf16.mxu1 (!%p325_p8), %v987_v6 }
  0x2e   : > { %s1148_s28 = smov (!%p385_p9, %s828_s28), 3 }
  0x2f   : > { %s829_s29 = sshll.u32 %s1148_s28, 2 }
  0x30   : > { %s391_s5 = scalar_lea.vmem %s1139_s3, %s829_s29 }
  0x32   : > { %859 = vmatmul.mubr.msk.bf16.vlgmr.msra.gmra.mrb[0].mxu0 %vm416_vm1, %v830_v13 }
  0x33   : > { %876 = vmatprep.mubr.msk.bf16.mxu0 %vm988_vm0, %v987_v6 }
 0x105   : > { %v457_v16 = vpop.f32.mrb[0].mxu0 }
 0x106   : > { %v464_v17 = vsel %vm397_vm2, %v457_v16, -1e+30  ;;  %v860_v18 = vpop.f32.mrb[1].mxu0 }
 0x107   : > { %v460_v19 = vpop.f32.mrb[2].mxu0  ;;  %v467_v20 = vsel %vm466_vm3, %v464_v17, -inf }
 0x108   : > { %v465_v21 = vsel %vm397_vm2, %v460_v19, -1e+30  ;;  %468 = vmax.xlane.f32.xlu0 %v467_v20  ;;  %v861_v22 = vpop.f32.mrb[3].mxu0 }
 0x109   : > { %v470_v23 = vsel %vm466_vm3, %v465_v21, -inf }
 0x10c   : > { %471 = vmax.xlane.f32.xlu0 %v470_v23 }
 0x122   : > { %542 = vrot.lane.b32.xlu0 %v929_v7, %s989_s26 }
 0x195   : > { %v469_v24 = vpop.xlane.xlu0 %468 }
 0x196   : > { %v473_v25 = vsub.f32 %v464_v17, %v469_v24 }
 0x198   : > { %v475_v26 = vmul.f32 1.442695, %v473_v25 }
 0x199   : > { %v472_v27 = vpop.xlane.xlu0 %471 }
 0x19a   : > { %931 = vpow2.f32 %v475_v26  ;;  %v474_v28 = vsub.f32 %v465_v21, %v472_v27 }
 0x19c   : > { %v477_v29 = vmul.f32 1.442695, %v474_v28 }
 0x19d   : > { %v543_v39 = vpop.permute.xlu0 %542 }
 0x19e   : > { %933 = vpow2.f32 %v477_v29  ;;  %v548_v42 = vsel %vm416_vm1, %v543_v39, 0 }
 0x1a4   : > { %v932_v30 = vpop.eup %931 }
 0x1a5   : > { %v479_v31 = vsel %vm466_vm3, %v932_v30, 0.0 }
 0x1a6   : > { %480 = vadd.xlane.f32.xlu1 %v479_v31 }
 0x1a8   : > { %v934_v32 = vpop.eup %933 }
 0x1a9   : > { %v482_v33 = vsel %vm466_vm3, %v934_v32, 0.0 }
 0x1aa   : > { %483 = vadd.xlane.f32.xlu1 %v482_v33 }
 0x1bb   : > { %540 = vrot.lane.b32.xlu1 %v830_v13, %s989_s26 }
 0x233   : > { %v481_v35 = vpop.xlane.xlu1 %480 }
 0x234   : > { %935 = vrcp.f32 %v481_v35 }
 0x237   : > { %v484_v36 = vpop.xlane.xlu1 %483 }
 0x238   : > { %937 = vrcp.f32 %v484_v36 }
 0x23b   : > { %v541_v44 = vpop.permute.xlu1 %540 }
 0x23e   : > { %v936_v37 = vpop.eup %935 }
 0x23f   : > { %v487_v40 = vmul.f32 %v936_v37, %v932_v30 }
 0x242   : > { %v938_v38 = vpop.eup %937 }
 0x243   : > { %v488_v41 = vmul.f32 %v938_v38, %v934_v32 }
 0x245   : > { %v489_v43 = vpack.c.bf16 %v488_v41, %v487_v40 }
 0x247   : > { %865 = vmatmul.mubr.msk.bf16.vlgmr.msra.gmra.mrb[0].mxu1 %vm466_vm3, %v489_v43 }
 0x248   : > { %869 = vmatpush3.bf16.xpose.msra.mxu1 %v548_v42  ;;  %870 = vmatprep.mubr.msk.bf16.mxu1 %vm988_vm0, %v987_v6 }
 0x24f   : > { %871 = vmatmul.mubr.msk.bf16.vlgmr.msra.gmra.mrb[4].mxu1 %vm416_vm1, %v541_v44 }
 0x31a   : > { %v533_v45 = vpop.f32.mrb[0].mxu1 }
 0x31b   : > { %v866_v46 = vpop.f32.mrb[1].mxu1 }
 0x31c   : > { %v536_v47 = vpop.f32.mrb[2].mxu1 }
 0x31d   : > { %v867_v48 = vpop.f32.mrb[3].mxu1 }
 0x322   : > { %v584_v49 = vpop.f32.mrb[4].mxu1 }
 0x323   : > { %v591_v50 = vsel %vm397_vm2, %v584_v49, -1e+30  ;;  %v872_v51 = vpop.f32.mrb[5].mxu1 }
 0x324   : > { %v587_v52 = vpop.f32.mrb[6].mxu1  ;;  %v593_v53 = vsel %vm466_vm3, %v591_v50, -inf }
 0x325   : > { %v592_v54 = vsel %vm397_vm2, %v587_v52, -1e+30  ;;  %594 = vmax.xlane.f32.xlu1 %v593_v53  ;;  %v873_v55 = vpop.f32.mrb[7].mxu1 }
 0x326   : > { %v596_v56 = vsel %vm466_vm3, %v592_v54, -inf }
 0x327   : > { %597 = vmax.xlane.f32.xlu0 %v596_v56 }
 0x3b2   : > { %v595_v57 = vpop.xlane.xlu1 %594 }
 0x3b3   : > { %v599_v58 = vsub.f32 %v591_v50, %v595_v57 }
 0x3b4   : > { %v598_v59 = vpop.xlane.xlu0 %597 }
 0x3b5   : > { %v601_v60 = vmul.f32 1.442695, %v599_v58  ;;  %v600_v61 = vsub.f32 %v592_v54, %v598_v59 }
 0x3b7   : > { %939 = vpow2.f32 %v601_v60  ;;  %v603_v62 = vmul.f32 1.442695, %v600_v61 }
 0x3b9   : > { %941 = vpow2.f32 %v603_v62 }
 0x3c1   : > { %v940_v63 = vpop.eup %939 }
 0x3c2   : > { %v605_v0 = vsel %vm466_vm3, %v940_v63, 0.0 }
 0x3c3   : > { %v942_v1 = vpop.eup %941  ;;  %606 = vadd.xlane.f32.xlu0 %v605_v0 }
 0x3c4   : > { %v608_v2 = vsel %vm466_vm3, %v942_v1, 0.0 }
 0x3c5   : > { %609 = vadd.xlane.f32.xlu1 %v608_v2 }
 0x3d9   : > { %616 = vrot.lane.b32.xlu0 %v930_v34, %s989_s26 }
 0x450   : > { %v607_v3 = vpop.xlane.xlu0 %606 }
 0x451   : > { %943 = vrcp.f32 %v607_v3 }
 0x452   : > { %v610_v4 = vpop.xlane.xlu1 %609 }
 0x453   : > { %945 = vrcp.f32 %v610_v4 }
 0x454   : > { %v617_v5 = vpop.permute.xlu0 %616 }
 0x455   : > { %875 = vmatpush3.bf16.msra.mxu0 %v617_v5 }
 0x45b   : > { %v944_v6 = vpop.eup %943 }
 0x45c   : > { %v613_v8 = vmul.f32 %v944_v6, %v940_v63 }
 0x45d   : > { %v946_v7 = vpop.eup %945 }
 0x45e   : > { %v614_v9 = vmul.f32 %v946_v7, %v942_v1 }
 0x460   : > { %v615_v10 = vpack.c.bf16 %v614_v9, %v613_v8 }
 0x462   : > { %877 = vmatmul.mubr.msk.bf16.vlgmr.msra.gmra.mrb[4].mxu0 %vm466_vm3, %v615_v10 }
 0x535   : > { %v656_v11 = vpop.f32.mrb[4].mxu0 }
 0x536   : > { %v878_v12 = vpop.f32.mrb[5].mxu0 }
 0x537   : > { %v659_v13 = vpop.f32.mrb[6].mxu0 }
 0x538   : > { %v924_v14 = vpack.i.bf16 %v659_v13, %v656_v11  ;;  %v879_v15 = vpop.f32.mrb[7].mxu0 }
 0x53a   : > { %925 = vrot.lane.b32.xlu1 %v924_v14, %s989_s26 }
 0x5ac   : > { %v926_v16 = vpop.permute.xlu1 %925 }
 0x5ad   : > { %v928_v17 = vunpack.i.h.bf16 %v926_v16  ;;  %v927_v18 = vunpack.i.l.bf16 %v926_v16 }
 0x5af   : > { %v672_v19 = vsel %vm416_vm1, %v536_v47, %v928_v17  ;;  %v671_v20 = vsel %vm416_vm1, %v533_v45, %v927_v18 }
 0x5b0   : > { %v846_v21 = vpack.c.bf16 %v672_v19, %v671_v20 }
 0x5b2   : > { %847 = vst [vmem:[%s391_s5] sm:$0xff] %v846_v21  }
 0x5b3 PF: > { %s13_s16 = sadd.s32 1, %s985_s16   ;;  %s1141_s12 = smov %s973_s13 }
 0x5b4   : > { %p10_p10 = scmp.ge.s32.totalorder %s13_s16, 4   ;;  %s1142_s13 = smov %s1049_s21 }
 0x5b5   : > { %s1143_s14 = smov %s981_s15  ;;  %s1144_s15 = smov %s1146_s17 }
 0x5b6   :  { %12 = sbr.rel (!%p10_p10) target bundleno = 3 (0x3), region = 206 }

// kernel: _lambda_.11
= control target key start
LH: loop header
LB: loop body
LE: loop exit
PB: predicated region body
PF: predicated region fallthrough
CT: control target
= control target key end

     0   :  { %v925_v58 = vmov 0   ;;  %s1220_s2 = inlined_call_operand.vmem [shape: bf16[128,128], index: 2, kind: input, shape index: {}]   ;;  %s1221_s0 = inlined_call_operand.vmem [shape: bf16[32,128], index: 0, kind: input, shape index: {}]   ;;  %s1222_s1 = inlined_call_operand.vmem [shape: bf16[32,128], index: 1, kind: input, shape index: {}]   ;;  %s1223_s3 = inlined_call_operand.vmem [shape: f32[1,128], index: 3, kind: input, shape index: {}]   ;;  %s1224_s6 = inlined_call_operand.vmem [shape: bf16[128,256], index: 6, kind: input, shape index: {}]   ;;  %s1225_s4 = inlined_call_operand.vmem [shape: f32[1,128], index: 4, kind: input, shape index: {}]   ;;  %s1226_s5 = inlined_call_operand.vmem [shape: f32[1,128], index: 5, kind: input, shape index: {}]   ;;  %s1227_s8 = inlined_call_operand.vmem [shape: bf16[256,128], index: 8, kind: input, shape index: {}]   ;;  %s1228_s7 = inlined_call_operand.vmem [shape: f32[1,256], index: 7, kind: input, shape index: {}]   ;;  %s1229_s9 = inlined_call_operand.vmem [shape: f32[1,128], index: 9, kind: input, shape index: {}]   ;;  %s1230_s10 = inlined_call_operand.vmem [shape: bf16[32,128], index: 10, kind: output, shape index: {}]  }
   0x1   :  { %v851_v0 = vld [vmem:[%s1220_s2] sm:$0xff]   ;;  %v852_v1 = vld [vmem:[%s1220_s2 + $0x8] sm:$0xff]   ;;  %v853_v2 = vld [vmem:[%s1220_s2 + $0x10] sm:$0xff]   ;;  %393 = vmatprep.mubr.bf16.mxu1 %v925_v58 }
   0x2   :  { %814 = vmatprep.subr.bf16.mxu0 %v851_v0  ;;  %v854_v3 = vld [vmem:[%s1220_s2 + $0x18] sm:$0xff]   ;;  %v859_v4 = vld [vmem:[%s1221_s0] sm:$0xff]   ;;  %v856_v6 = vld [vmem:[%s1220_s2 + $0x28] sm:$0xff]  }
   0x3   :  { %815 = vmatpush3.bf16.msra.mxu0 %v851_v0  ;;  %830 = vmatprep.mubr.bf16.mxu0 %v859_v4  ;;  %v855_v5 = vld [vmem:[%s1220_s2 + $0x20] sm:$0xff]   ;;  %v857_v7 = vld [vmem:[%s1220_s2 + $0x30] sm:$0xff]   ;;  %v858_v8 = vld [vmem:[%s1220_s2 + $0x38] sm:$0xff]  }
   0x4   :  { %816 = vmatprep.subr.bf16.mxu0 %v852_v1  ;;  %v860_v9 = vld [vmem:[%s1221_s0 + $0x8] sm:$0xff]   ;;  %v757_v11 = vld [vmem:[%s1222_s1] sm:$0xff]   ;;  %v864_v31 = vld [vmem:[%s1224_s6 + $0x14] ss:$8 sps:$4 sm:$0xff]  }
   0x5   :  { %v774_v10 = vld [vmem:[%s1222_s1 + $0x8] sm:$0xff]   ;;  %v702_v12 = vld [vmem:[%s1223_s3] ss:$0 sm:$0xff]  ;;  %v758_v15 = vunpack.c.l.bf16 %v757_v11  ;;  %v759_v26 = vunpack.c.h.bf16 %v757_v11  ;;  %v866_v48 = vld [vmem:[%s1224_s6 + $0x10] ss:$8 sps:$4 sm:$0xff]  }
   0x6   :  { %v762_v13 = vunpack.c.l.bf16 %v774_v10  ;;  %v763_v22 = vunpack.c.h.bf16 %v774_v10  ;;  %v861_v29 = vld [vmem:[%s1224_s6 + $0x4] ss:$8 sps:$4 sm:$0xff]   ;;  %v863_v30 = vld [vmem:[%s1224_s6] ss:$8 sps:$4 sm:$0xff]   ;;  %v870_v51 = vld [vmem:[%s1224_s6 + $0x34] ss:$8 sps:$4 sm:$0xff]  }
   0x7   :  { %817 = vmatpush3.bf16.msra.mxu0 %v852_v1  ;;  %361 = vmatprep.subr.bf16.mxu1 %v861_v29  ;;  %v867_v49 = vld [vmem:[%s1224_s6 + $0x24] ss:$8 sps:$4 sm:$0xff]   ;;  %v869_v50 = vld [vmem:[%s1224_s6 + $0x20] ss:$8 sps:$4 sm:$0xff]   ;;  %v872_v52 = vld [vmem:[%s1224_s6 + $0x30] ss:$8 sps:$4 sm:$0xff]  }
   0x8   :  { %818 = vmatprep.subr.bf16.mxu0 %v853_v2  ;;  %362 = vmatpush1.bf16.msra.mxu1 %v863_v30  ;;  %v873_v53 = vld [vmem:[%s1224_s6 + $0x44] ss:$8 sps:$4 sm:$0xff]   ;;  %v875_v54 = vld [vmem:[%s1224_s6 + $0x40] ss:$8 sps:$4 sm:$0xff]   ;;  %v876_v55 = vld [vmem:[%s1224_s6 + $0x54] ss:$8 sps:$4 sm:$0xff]  }
   0x9   :  { %363 = vmatprep.subr.bf16.mxu1 %v864_v31  ;;  %v878_v56 = vld [vmem:[%s1224_s6 + $0x50] ss:$8 sps:$4 sm:$0xff]   ;;  %v879_v57 = vld [vmem:[%s1224_s6 + $0x64] ss:$8 sps:$4 sm:$0xff]   ;;  %v881_v59 = vld [vmem:[%s1224_s6 + $0x60] ss:$8 sps:$4 sm:$0xff]  }
   0xa   :  { %v882_v60 = vld [vmem:[%s1224_s6 + $0x74] ss:$8 sps:$4 sm:$0xff]   ;;  %v884_v61 = vld [vmem:[%s1224_s6 + $0x70] ss:$8 sps:$4 sm:$0xff]  }
   0xb   :  { %819 = vmatpush3.bf16.msra.mxu0 %v853_v2 }
   0xc   :  { %820 = vmatprep.subr.bf16.mxu0 %v854_v3  ;;  %364 = vmatpush1.bf16.msra.mxu1 %v866_v48  ;;  %v899_v48 = vld [vmem:[%s1227_s8 + $0x78] sm:$0xff]  }
   0xd   :  { %365 = vmatprep.subr.bf16.mxu1 %v867_v49  ;;  %v900_v49 = vld [vmem:[%s1227_s8 + $0x38] sm:$0xff]  }
   0xf   :  { %821 = vmatpush3.bf16.msra.mxu0 %v854_v3 }
  0x10   :  { %822 = vmatprep.subr.bf16.mxu0 %v855_v5  ;;  %366 = vmatpush1.bf16.msra.mxu1 %v869_v50  ;;  %v271_v50 = vlaneseq }
  0x11   :  { %367 = vmatprep.subr.bf16.mxu1 %v870_v51 }
  0x12   :  { %v272_v51 = vshrl.u32 %v271_v50, 7 }
  0x13   :  { %823 = vmatpush3.bf16.msra.mxu0 %v855_v5 }
  0x14   :  { %824 = vmatprep.subr.bf16.mxu0 %v856_v6  ;;  %368 = vmatpush1.bf16.msra.mxu1 %v872_v52  ;;  %v273_v52 = vsub.s32 0, %v272_v51 }
  0x15   :  { %369 = vmatprep.subr.bf16.mxu1 %v873_v53  ;;  %v269_v53 = vld [vmem:[%s1228_s7] sm:$0x3] }
  0x17   :  { %825 = vmatpush3.bf16.msra.mxu0 %v856_v6 }
  0x18   :  { %826 = vmatprep.subr.bf16.mxu0 %v857_v7  ;;  %370 = vmatpush1.bf16.msra.mxu1 %v875_v54  ;;  %v277_v54 = vsub.s32 1, %v272_v51 }
  0x19   :  { %371 = vmatprep.subr.bf16.mxu1 %v876_v55  ;;  %v274_v55 = vrot.slane %v269_v53, %v273_v52 }
  0x1b   :  { %827 = vmatpush3.bf16.msra.mxu0 %v857_v7 }
  0x1c   :  { %828 = vmatprep.subr.bf16.mxu0 %v858_v8  ;;  %372 = vmatpush1.bf16.msra.mxu1 %v878_v56  ;;  %v278_v56 = vrot.slane %v269_v53, %v277_v54 }
  0x1d   :  { %373 = vmatprep.subr.bf16.mxu1 %v879_v57 }
  0x1f   :  { %829 = vmatpush3.bf16.msra.mxu0 %v858_v8 }
  0x20   :  { %374 = vmatpush1.bf16.msra.mxu1 %v881_v59 }
  0x21   :  { %375 = vmatprep.subr.bf16.mxu1 %v882_v60 }
  0x22   :  { %831 = vmatmul.mubr.bf16.vlgmr.msra.gmra.mrb[0].mxu0 %v860_v9 }
  0x24   :  { %376 = vmatpush1.bf16.msra.mxu1 %v884_v61 }
  0xf5   :  { %v832_v14 = vpop.f32.mrb[0].mxu0 }
  0xf6   :  { %v166_v16 = vadd.f32 %v832_v14, %v702_v12  ;;  %v157_v17 = vpop.f32.mrb[1].mxu0 }
  0xf7   :  { %v158_v18 = vadd.f32 %v702_v12, %v157_v17  ;;  %v833_v19 = vpop.f32.mrb[2].mxu0  ;;  %v714_v17 = vld [vmem:[%s1226_s5] ss:$0 sm:$0xff] }
  0xf8   :  { %v1020_v20 = vadd.f32 %v762_v13, %v166_v16  ;;  %v169_v21 = vadd.f32 %v833_v19, %v702_v12  ;;  %v160_v23 = vpop.f32.mrb[3].mxu0 }
  0xf9   :  { %v1022_v24 = vadd.f32 %v758_v15, %v158_v18  ;;  %v161_v25 = vadd.f32 %v702_v12, %v160_v23  ;;  %v713_v12 = vld [vmem:[%s1225_s4] ss:$0 sm:$0xff] }
  0xfa   :  { %188 = vadd.xlane.f32.xlu1 %v1020_v20  ;;  %v1026_v27 = vadd.f32 %v763_v22, %v169_v21 }
  0xfb   :  { %184 = vadd.xlane.f32.xlu0 %v1022_v24  ;;  %v1028_v28 = vadd.f32 %v759_v26, %v161_v25 }
  0xfe   :  { %190 = vadd.xlane.f32.xlu1 %v1026_v27 }
  0xff   :  { %186 = vadd.xlane.f32.xlu0 %v1028_v28 }
 0x187   :  { %v189_v32 = vpop.xlane.xlu1 %188 }
 0x188   :  { %v185_v33 = vpop.xlane.xlu0 %184  ;;  %v195_v34 = vmul.f32 0.0078125, %v189_v32 }
 0x189   :  { %v193_v35 = vmul.f32 0.0078125, %v185_v33 }
 0x18a   :  { %v1043_v39 = vsub.f32 %v1020_v20, %v195_v34  ;;  %v885_v34 = vld [vmem:[%s1227_s8 + $0x40] sm:$0xff]  }
 0x18b   :  { %v197_v36 = vsub.f32 %v1022_v24, %v193_v35  ;;  %v191_v37 = vpop.xlane.xlu1 %190  ;;  %v886_v35 = vld [vmem:[%s1227_s8] sm:$0xff]   ;;  %786 = vmatprep.subr.bf16.mxu0 %v885_v34  ;;  %834 = vmatprep.subr.bf16.mxu1 %v885_v34 }
 0x18c   :  { %v187_v38 = vpop.xlane.xlu0 %186  ;;  %v196_v40 = vmul.f32 0.0078125, %v191_v37  ;;  %v203_v45 = vmul.f32 %v1043_v39, %v1043_v39  ;;  %787 = vmatpush3.bf16.msra.mxu0 %v886_v35  ;;  %v888_v37 = vld [vmem:[%s1227_s8 + $0x8] sm:$0xff]  }
 0x18d   :  { %v194_v41 = vmul.f32 0.0078125, %v187_v38  ;;  %v201_v42 = vmul.f32 %v197_v36, %v197_v36  ;;  %v889_v38 = vld [vmem:[%s1227_s8 + $0x50] sm:$0xff]  }
 0x18e   :  { %v1047_v44 = vsub.f32 %v1026_v27, %v196_v40  ;;  %v891_v40 = vld [vmem:[%s1227_s8 + $0x58] sm:$0xff]  }
 0x18f   :  { %v198_v43 = vsub.f32 %v1028_v28, %v194_v41  ;;  %205 = vadd.xlane.f32.xlu0 %v201_v42  ;;  %v892_v41 = vld [vmem:[%s1227_s8 + $0x18] sm:$0xff]   ;;  %v893_v42 = vld [vmem:[%s1227_s8 + $0x60] sm:$0xff]  }
 0x190   :  { %v204_v47 = vmul.f32 %v1047_v44, %v1047_v44 }
 0x191   :  { %v202_v46 = vmul.f32 %v198_v43, %v198_v43 }
 0x193   :  { %209 = vadd.xlane.f32.xlu0 %v203_v45  ;;  %207 = vadd.xlane.f32.xlu1 %v202_v46  ;;  %v896_v45 = vld [vmem:[%s1227_s8 + $0x28] sm:$0xff]   ;;  %v897_v46 = vld [vmem:[%s1227_s8 + $0x70] sm:$0xff]  }
 0x197   :  { %211 = vadd.xlane.f32.xlu1 %v204_v47  ;;  %v898_v47 = vld [vmem:[%s1227_s8 + $0x30] sm:$0xff]  }
 0x21c   :  { %v206_v62 = vpop.xlane.xlu0 %205 }
 0x21d   :  { %v213_v63 = vmul.f32 0.0078125, %v206_v62 }
 0x21f   :  { %v217_v0 = vadd.f32 1e-12, %v213_v63 }
 0x220   :  { %v208_v1 = vpop.xlane.xlu1 %207  ;;  %v210_v2 = vpop.xlane.xlu0 %209 }
 0x221   :  { %901 = vrsqrt.f32 %v217_v0  ;;  %v214_v3 = vmul.f32 0.0078125, %v208_v1  ;;  %v215_v4 = vmul.f32 0.0078125, %v210_v2 }
 0x223   :  { %v218_v5 = vadd.f32 1e-12, %v214_v3  ;;  %v219_v6 = vadd.f32 1e-12, %v215_v4 }
 0x224   :  { %v212_v7 = vpop.xlane.xlu1 %211 }
 0x225   :  { %903 = vrsqrt.f32 %v218_v5  ;;  %v216_v8 = vmul.f32 0.0078125, %v212_v7 }
 0x226   :  { %905 = vrsqrt.f32 %v219_v6 }
 0x227   :  { %v220_v9 = vadd.f32 1e-12, %v216_v8 }
 0x229   :  { %907 = vrsqrt.f32 %v220_v9 }
 0x22b   :  { %v902_v10 = vpop.eup %901 }
 0x22c   :  { %v225_v11 = vmul.f32 %v902_v10, %v197_v36  ;;  %v887_v36 = vld [vmem:[%s1227_s8 + $0x48] sm:$0xff]  }
 0x22d   :  { %788 = vmatprep.subr.bf16.mxu0 %v887_v36 }
 0x22e   :  { %v236_v15 = vmul.f32 %v713_v12, %v225_v11  ;;  %789 = vmatpush3.bf16.msra.mxu0 %v888_v37 }
 0x22f   :  { %v904_v13 = vpop.eup %903  ;;  %790 = vmatprep.subr.bf16.mxu0 %v889_v38 }
 0x230   :  { %v226_v14 = vmul.f32 %v904_v13, %v198_v43  ;;  %v906_v16 = vpop.eup %905  ;;  %v247_v21 = vadd.f32 %v714_v17, %v236_v15  ;;  %v894_v43 = vld [vmem:[%s1227_s8 + $0x20] sm:$0xff]  }
 0x231   :  { %v227_v23 = vmul.f32 %v906_v16, %v1043_v39  ;;  %v890_v39 = vld [vmem:[%s1227_s8 + $0x10] sm:$0xff]  }
 0x232   :  { %v237_v18 = vmul.f32 %v713_v12, %v226_v14  ;;  %791 = vmatpush3.bf16.msra.mxu0 %v890_v39 }
 0x233   :  { %v908_v19 = vpop.eup %907  ;;  %v238_v30 = vmul.f32 %v713_v12, %v227_v23  ;;  %792 = vmatprep.subr.bf16.mxu0 %v891_v40 }
 0x234   :  { %v248_v22 = vadd.f32 %v714_v17, %v237_v18  ;;  %v228_v25 = vmul.f32 %v908_v19, %v1047_v44  ;;  %v895_v44 = vld [vmem:[%s1227_s8 + $0x68] sm:$0xff]  }
 0x235   :  { %v249_v32 = vadd.f32 %v714_v17, %v238_v30 }
 0x236   :  { %v251_v26 = vpack.c.bf16 %v248_v22, %v247_v21  ;;  %v239_v29 = vmul.f32 %v713_v12, %v228_v25  ;;  %793 = vmatpush3.bf16.msra.mxu0 %v892_v41 }
 0x237   :  { %794 = vmatprep.subr.bf16.mxu0 %v893_v42 }
 0x238   :  { %394 = vmatmul.mubr.bf16.vlgmr.msra.gmra.mrb[0].mxu1 %v251_v26  ;;  %v250_v31 = vadd.f32 %v714_v17, %v239_v29 }
 0x239   :  { %403 = vmatprep.mubr.bf16.mxu1 %v925_v58  ;;  %842 = vmatpush3.bf16.msra.mxu1 %v886_v35 }
 0x23a   :  { %v252_v33 = vpack.c.bf16 %v250_v31, %v249_v32  ;;  %835 = vmatprep.subr.bf16.mxu1 %v887_v36  ;;  %795 = vmatpush3.bf16.msra.mxu0 %v894_v43 }
 0x23b   :  { %796 = vmatprep.subr.bf16.mxu0 %v895_v44 }
 0x23d   :  { %843 = vmatpush3.bf16.msra.mxu1 %v888_v37 }
 0x23e   :  { %836 = vmatprep.subr.bf16.mxu1 %v889_v38  ;;  %797 = vmatpush3.bf16.msra.mxu0 %v896_v45 }
 0x23f   :  { %798 = vmatprep.subr.bf16.mxu0 %v897_v46 }
 0x240   :  { %404 = vmatmul.mubr.bf16.gmra.mrb[4].mxu1 %v252_v33 }
 0x241   :  { %844 = vmatpush3.bf16.msra.mxu1 %v890_v39 }
 0x242   :  { %837 = vmatprep.subr.bf16.mxu1 %v891_v40  ;;  %799 = vmatpush3.bf16.msra.mxu0 %v898_v47 }
 0x243   :  { %800 = vmatprep.subr.bf16.mxu0 %v899_v48 }
 0x245   :  { %845 = vmatpush3.bf16.msra.mxu1 %v892_v41 }
 0x246   :  { %838 = vmatprep.subr.bf16.mxu1 %v893_v42  ;;  %801 = vmatpush3.bf16.msra.mxu0 %v900_v49 }
 0x249   :  { %846 = vmatpush3.bf16.msra.mxu1 %v894_v43 }
 0x24a   :  { %839 = vmatprep.subr.bf16.mxu1 %v895_v44 }
 0x24d   :  { %847 = vmatpush3.bf16.msra.mxu1 %v896_v45 }
 0x24e   :  { %840 = vmatprep.subr.bf16.mxu1 %v897_v46 }
 0x251   :  { %848 = vmatpush3.bf16.msra.mxu1 %v898_v47 }
 0x252   :  { %841 = vmatprep.subr.bf16.mxu1 %v899_v48 }
 0x255   :  { %849 = vmatpush3.bf16.msra.mxu1 %v900_v49 }
 0x30b   :  { %v395_v57 = vpop.f32.mrb[0].mxu1 }
 0x30c   :  { %v1151_v58 = vadd.f32 %v395_v57, %v274_v55  ;;  %v397_v59 = vpop.f32.mrb[1].mxu1 }
 0x30d   :  { %v1153_v60 = vadd.f32 %v397_v59, %v278_v56  ;;  %v399_v61 = vpop.f32.mrb[2].mxu1 }
 0x30e   :  { %v414_v62 = vmul.f32 %v1151_v58, %v1151_v58  ;;  %v1157_v63 = vadd.f32 %v399_v61, %v274_v55  ;;  %v401_v0 = vpop.f32.mrb[3].mxu1 }
 0x30f   :  { %v415_v1 = vmul.f32 %v1153_v60, %v1153_v60  ;;  %v1161_v2 = vadd.f32 %v401_v0, %v278_v56 }
 0x310   :  { %v422_v3 = vmul.f32 %v414_v62, %v1151_v58  ;;  %v416_v4 = vmul.f32 %v1157_v63, %v1157_v63 }
 0x311   :  { %v423_v5 = vmul.f32 %v415_v1, %v1153_v60  ;;  %v417_v6 = vmul.f32 %v1161_v2, %v1161_v2 }
 0x312   :  { %v430_v7 = vmul.f32 0.044715, %v422_v3  ;;  %v424_v8 = vmul.f32 %v416_v4, %v1157_v63 }
 0x313   :  { %v431_v9 = vmul.f32 0.044715, %v423_v5  ;;  %v425_v10 = vmul.f32 %v417_v6, %v1161_v2  ;;  %v405_v11 = vpop.f32.mrb[4].mxu1 }
 0x314   :  { %v438_v12 = vadd.f32 %v430_v7, %v1151_v58  ;;  %v432_v13 = vmul.f32 0.044715, %v424_v8  ;;  %v1172_v14 = vadd.f32 %v405_v11, %v274_v55  ;;  %v407_v15 = vpop.f32.mrb[5].mxu1 }
 0x315   :  { %v439_v16 = vadd.f32 %v431_v9, %v1153_v60  ;;  %v433_v17 = vmul.f32 0.044715, %v425_v10  ;;  %v1175_v18 = vadd.f32 %v407_v15, %v278_v56  ;;  %v409_v19 = vpop.f32.mrb[6].mxu1 }
 0x316   :  { %v446_v21 = vmul.f32 0.7978846, %v438_v12  ;;  %v440_v22 = vadd.f32 %v432_v13, %v1157_v63  ;;  %v418_v23 = vmul.f32 %v1172_v14, %v1172_v14  ;;  %v1180_v25 = vadd.f32 %v409_v19, %v274_v55  ;;  %v411_v26 = vpop.f32.mrb[7].mxu1 }
 0x317   :  { %v447_v29 = vmul.f32 0.7978846, %v439_v16  ;;  %v441_v30 = vadd.f32 %v433_v17, %v1161_v2  ;;  %v419_v31 = vmul.f32 %v1175_v18, %v1175_v18  ;;  %v1185_v32 = vadd.f32 %v411_v26, %v278_v56 }
 0x318   :  { %909 = vtanh.f32 %v446_v21  ;;  %v448_v33 = vmul.f32 0.7978846, %v440_v22  ;;  %v426_v34 = vmul.f32 %v418_v23, %v1172_v14  ;;  %v420_v35 = vmul.f32 %v1180_v25, %v1180_v25 }
 0x319   :  { %911 = vtanh.f32 %v447_v29  ;;  %v449_v36 = vmul.f32 0.7978846, %v441_v30  ;;  %v427_v37 = vmul.f32 %v419_v31, %v1175_v18  ;;  %v421_v38 = vmul.f32 %v1185_v32, %v1185_v32 }
 0x31a   :  { %913 = vtanh.f32 %v448_v33  ;;  %v434_v39 = vmul.f32 0.044715, %v426_v34  ;;  %v428_v40 = vmul.f32 %v420_v35, %v1180_v25  ;;  %v731_v34 = vld [vmem:[%s1229_s9] ss:$0 sm:$0xff] }
 0x31b   :  { %915 = vtanh.f32 %v449_v36  ;;  %v435_v41 = vmul.f32 0.044715, %v427_v37  ;;  %v429_v42 = vmul.f32 %v421_v38, %v1185_v32 }
 0x31c   :  { %v442_v43 = vadd.f32 %v434_v39, %v1172_v14  ;;  %v436_v44 = vmul.f32 0.044715, %v428_v40 }
 0x31d   :  { %v443_v45 = vadd.f32 %v435_v41, %v1175_v18  ;;  %v437_v46 = vmul.f32 0.044715, %v429_v42 }
 0x31e   :  { %v450_v47 = vmul.f32 0.7978846, %v442_v43  ;;  %v444_v48 = vadd.f32 %v436_v44, %v1180_v25 }
 0x31f   :  { %v451_v49 = vmul.f32 0.7978846, %v443_v45  ;;  %v445_v50 = vadd.f32 %v437_v46, %v1185_v32 }
 0x320   :  { %917 = vtanh.f32 %v450_v47  ;;  %v452_v51 = vmul.f32 0.7978846, %v444_v48 }
 0x321   :  { %919 = vtanh.f32 %v451_v49  ;;  %v453_v52 = vmul.f32 0.7978846, %v445_v50 }
 0x322   :  { %v910_v53 = vpop.eup %909  ;;  %921 = vtanh.f32 %v452_v51 }
 0x323   :  { %v912_v54 = vpop.eup %911  ;;  %v462_v55 = vadd.f32 1.0, %v910_v53  ;;  %923 = vtanh.f32 %v453_v52 }
 0x324   :  { %v914_v56 = vpop.eup %913  ;;  %v463_v57 = vadd.f32 1.0, %v912_v54 }
 0x325   :  { %v916_v59 = vpop.eup %915  ;;  %v470_v61 = vmul.f32 0.5, %v462_v55  ;;  %v464_v62 = vadd.f32 1.0, %v914_v56 }
 0x326   :  { %v465_v0 = vadd.f32 1.0, %v916_v59  ;;  %v471_v1 = vmul.f32 0.5, %v463_v57 }
 0x327   :  { %v472_v3 = vmul.f32 0.5, %v464_v62  ;;  %v478_v5 = vmul.f32 %v470_v61, %v1151_v58 }
 0x328   :  { %v473_v4 = vmul.f32 0.5, %v465_v0  ;;  %v479_v8 = vmul.f32 %v471_v1, %v1153_v60 }
 0x329   :  { %v480_v6 = vmul.f32 %v472_v3, %v1157_v63 }
 0x32a   :  { %v918_v7 = vpop.eup %917  ;;  %v481_v9 = vmul.f32 %v473_v4, %v1161_v2 }
 0x32b   :  { %v920_v10 = vpop.eup %919  ;;  %v466_v11 = vadd.f32 1.0, %v918_v7  ;;  %v486_v12 = vpack.c.bf16 %v480_v6, %v478_v5 }
 0x32c   :  { %v922_v13 = vpop.eup %921  ;;  %v487_v15 = vpack.c.bf16 %v481_v9, %v479_v8  ;;  %v467_v16 = vadd.f32 1.0, %v920_v10 }
 0x32d   :  { %v924_v17 = vpop.eup %923  ;;  %v474_v19 = vmul.f32 0.5, %v466_v11  ;;  %v468_v21 = vadd.f32 1.0, %v922_v13 }
 0x32e   :  { %657 = vmatprep.mubr.bf16.mxu0 %v487_v15  ;;  %v469_v22 = vadd.f32 1.0, %v924_v17  ;;  %v475_v23 = vmul.f32 0.5, %v467_v16 }
 0x32f   :  { %v476_v58 = vmul.f32 0.5, %v468_v21  ;;  %658 = vmatmul.mubr.bf16.vlgmr.msra.gmra.mrb[4].mxu0 %v486_v12  ;;  %v482_v26 = vmul.f32 %v474_v19, %v1172_v14 }
 0x330   :  { %v477_v63 = vmul.f32 0.5, %v469_v22  ;;  %v483_v2 = vmul.f32 %v475_v23, %v1175_v18 }
 0x331   :  { %v484_v60 = vmul.f32 %v476_v58, %v1180_v25 }
 0x332   :  { %v485_v29 = vmul.f32 %v477_v63, %v1185_v32 }
 0x333   :  { %v488_v30 = vpack.c.bf16 %v484_v60, %v482_v26 }
 0x334   :  { %v489_v31 = vpack.c.bf16 %v485_v29, %v483_v2 }
 0x336   :  { %665 = vmatprep.mubr.bf16.mxu1 %v489_v31 }
 0x337   :  { %666 = vmatmul.mubr.bf16.vlgmr.msra.gmra.mrb[8].mxu1 %v488_v30 }
 0x402   :  { %v802_v33 = vpop.f32.mrb[4].mxu0 }
 0x403   :  { %v803_v35 = vpop.f32.mrb[5].mxu0 }
 0x404   :  { %v804_v36 = vadd.f32 %v803_v35, %v802_v33  ;;  %v805_v37 = vpop.f32.mrb[6].mxu0 }
 0x405   :  { %v806_v38 = vpop.f32.mrb[7].mxu0 }
 0x406   :  { %v660_v14 = vadd.f32 %v804_v36, %v731_v34  ;;  %v807_v39 = vadd.f32 %v806_v38, %v805_v37 }
 0x408   :  { %v663_v25 = vadd.f32 %v807_v39, %v731_v34  ;;  %v674_v18 = vadd.f32 %v660_v14, %v1022_v24 }
 0x40a   :  { %v675_v32 = vadd.f32 %v663_v25, %v1028_v28  ;;  %v808_v40 = vpop.f32.mrb[8].mxu1 }
 0x40b   :  { %v809_v41 = vpop.f32.mrb[9].mxu1 }
 0x40c   :  { %v767_v42 = vpack.c.bf16 %v675_v32, %v674_v18  ;;  %v810_v43 = vadd.f32 %v809_v41, %v808_v40  ;;  %v811_v44 = vpop.f32.mrb[10].mxu1 }
 0x40d   :  { %v812_v45 = vpop.f32.mrb[11].mxu1 }
 0x40e   :  { %768 = vst [vmem:[%s1230_s10] sm:$0xff] %v767_v42   ;;  %v668_v46 = vadd.f32 %v810_v43, %v731_v34  ;;  %v813_v47 = vadd.f32 %v812_v45, %v811_v44 }
 0x410   :  { %v671_v48 = vadd.f32 %v813_v47, %v731_v34  ;;  %v676_v49 = vadd.f32 %v668_v46, %v1020_v20 }
 0x412   :  { %v677_v50 = vadd.f32 %v671_v48, %v1026_v27 }
 0x414   :  { %v772_v24 = vpack.c.bf16 %v677_v50, %v676_v49 }
 0x416   :  { %775 = vst [vmem:[%s1230_s10 + $0x8] sm:$0xff] %v772_v24  }

// kernel: _lambda_.15
= control target key start
LH: loop header
LB: loop body
LE: loop exit
PB: predicated region body
PF: predicated region fallthrough
CT: control target
= control target key end

     0   :  { %vm24_vm0 = vcmask 1041408   ;;  %s352_s0 = inlined_call_operand.vmem [shape: bf16[2,128], index: 0, kind: input, shape index: {}]   ;;  %s353_s1 = inlined_call_operand.vmem [shape: f32[1,128], index: 1, kind: input, shape index: {}]   ;;  %s354_s2 = inlined_call_operand.vmem [shape: f32[1,128], index: 2, kind: input, shape index: {}]   ;;  %s355_s3 = inlined_call_operand.vmem [shape: bf16[128,128], index: 3, kind: input, shape index: {}]   ;;  %s356_s4 = inlined_call_operand.vmem [shape: f32[1,128], index: 4, kind: input, shape index: {}]   ;;  %s357_s5 = inlined_call_operand.hbm [shape: f32[2,128], index: 5, kind: output, shape index: {}]  }
   0x1   :  { %v22_v0 = vld [vmem:[%s352_s0] sm:$0x1] }
   0x2   :  { %v23_v1 = vunpack.c.l.bf16 %v22_v0 }
   0x4   :  { %v25_v2 = vsel %vm24_vm0, %v23_v1, 0.0 }
   0x5   :  { %26 = vadd.xlane.f32.xlu0 %v25_v2 }
   0x6   :  { %10 = vsyncpa [#allocation3], 0  ;;  %v232_v3 = vld [vmem:[%s355_s3] sm:$0xff]   ;;  %v268_v4 = vmov 0.0   ;;  %v233_v5 = vld [vmem:[%s355_s3 + $0x8] sm:$0xff]   ;;  %vm269_vm1 = vmmov 0  }
   0x7   :  { %209 = vmatprep.subr.bf16.mxu0 %v268_v4  ;;  %v234_v11 = vld [vmem:[%s355_s3 + $0x10] sm:$0xff]   ;;  %v235_v12 = vld [vmem:[%s355_s3 + $0x18] sm:$0xff]   ;;  %v236_v13 = vld [vmem:[%s355_s3 + $0x20] sm:$0xff]   ;;  %225 = vmatprep.mubr.msk.bf16.mxu0 %vm269_vm1, %v268_v4 }
   0x8   :  { %210 = vmatpush3.bf16.msra.mxu0 %v232_v3  ;;  %v237_v14 = vld [vmem:[%s355_s3 + $0x28] sm:$0xff]   ;;  %v238_v15 = vld [vmem:[%s355_s3 + $0x30] sm:$0xff]   ;;  %v239_v16 = vld [vmem:[%s355_s3 + $0x38] sm:$0xff]  }
   0x9   :  { %211 = vmatprep.subr.bf16.mxu0 %v268_v4  ;;  %v189_v21 = vld [vmem:[%s353_s1] ss:$0 sm:$0xff]  ;;  %s270_s1 = smov [#allocation2]  }
   0xa   :  { %v190_v23 = vld [vmem:[%s354_s2] ss:$0 sm:$0xff]  ;;  %s181_s2 = sshll.u32 %s270_s1, 4  ;;  %s182_s2 = int_to_ptr.vmem [resolvable:$true] %s181_s2 }
   0xb   :  { %v191_v27 = vld [vmem:[%s356_s4] ss:$0 sm:$0xff]  ;;  %s244_s15 = scalar_lea.vmem %s182_s2, 32  ;;  %p249_p1 = scmp.lt.s32.totalorder %s182_s2, %s182_s2 }
   0xc   :  { %212 = vmatpush3.bf16.msra.mxu0 %v233_v5  ;;  %p245_p0 = scmp.ne.s32.totalorder %s182_s2, %s244_s15  ;;  %p250_p2 = scmp.lt.s32.totalorder %s244_s15, %s244_s15 }
   0xd   :  { %213 = vmatprep.subr.bf16.mxu0 %v268_v4 }
   0xe   :  { %p251_p3 = por %p250_p2, %p249_p1 }
  0x10   :  { %214 = vmatpush3.bf16.msra.mxu0 %v234_v11  ;;  %p252_p4 = pnand %p251_p3, %p245_p0 }
  0x11   :  { %215 = vmatprep.subr.bf16.mxu0 %v268_v4 }
  0x14   :  { %216 = vmatpush3.bf16.msra.mxu0 %v235_v12 }
  0x15   :  { %217 = vmatprep.subr.bf16.mxu0 %v268_v4 }
  0x18   :  { %218 = vmatpush3.bf16.msra.mxu0 %v236_v13 }
  0x19   :  { %219 = vmatprep.subr.bf16.mxu0 %v268_v4 }
  0x1c   :  { %220 = vmatpush3.bf16.msra.mxu0 %v237_v14 }
  0x1d   :  { %221 = vmatprep.subr.bf16.mxu0 %v268_v4 }
  0x20   :  { %222 = vmatpush3.bf16.msra.mxu0 %v238_v15 }
  0x21   :  { %223 = vmatprep.subr.bf16.mxu0 %v268_v4 }
  0x24   :  { %224 = vmatpush3.bf16.msra.mxu0 %v239_v16 }
  0x92   :  { %v27_v6 = vpop.xlane.xlu0 %26 }
  0x93   :  { %v29_v7 = vmul.f32 0.0078125, %v27_v6 }
  0x95   :  { %v30_v8 = vsub.f32 %v23_v1, %v29_v7 }
  0x97   :  { %v31_v9 = vmul.f32 %v30_v8, %v30_v8 }
  0x99   :  { %v32_v10 = vsel %vm24_vm0, %v31_v9, 0.0 }
  0x9a   :  { %33 = vadd.xlane.f32.xlu0 %v32_v10 }
 0x127   :  { %v34_v17 = vpop.xlane.xlu0 %33 }
 0x128   :  { %v35_v18 = vmul.f32 0.0078125, %v34_v17 }
 0x12a   :  { %v36_v19 = vadd.f32 1e-12, %v35_v18 }
 0x12c   :  { %240 = vrsqrt.f32 %v36_v19 }
 0x136   :  { %v241_v20 = vpop.eup %240 }
 0x137   :  { %v38_v22 = vmul.f32 %v241_v20, %v30_v8 }
 0x139   :  { %v46_v24 = vmul.f32 %v189_v21, %v38_v22 }
 0x13b   :  { %v54_v25 = vadd.f32 %v190_v23, %v46_v24 }
 0x13d   :  { %v55_v26 = vpack.c.bf16 %v54_v25, %v54_v25 }
 0x13f   :  { %226 = vmatmul.mubr.bf16.vlgmr.msra.gmra.mrb[0].mxu0 %v55_v26 }
 0x212   :  { %v161_v28 = vpop.f32.mrb[0].mxu0 }
 0x213   :  { %v162_v29 = vadd.f32 %v191_v27, %v161_v28  ;;  %v227_v30 = vpop.f32.mrb[1].mxu0 }
 0x214   :  { %v164_v31 = vpop.f32.mrb[2].mxu0 }
 0x215   :  { %v228_v32 = vpop.f32.mrb[3].mxu0  ;;  %v167_v33 = vmul.f32 %v162_v29, %v162_v29 }
 0x217   :  { %v168_v34 = vsel %vm24_vm0, %v167_v33, 0.0 }
 0x218   :  { %169 = vadd.xlane.f32.xlu1 %v168_v34 }
 0x2a5   :  { %v170_v35 = vpop.xlane.xlu1 %169 }
 0x2a6   :  { %v171_v36 = vmax.f32 %v170_v35, 1e-24 }
 0x2a8   :  { %242 = vrsqrt.f32 %v171_v36 }
 0x2b2   :  { %v243_v37 = vpop.eup %242 }
 0x2b3   :  { %v173_v38 = vmul.f32 %v243_v37, %v162_v29 }
 0x2b5   :  { %174 = vst [vmem:[#allocation2] sm:$0x3] %v173_v38 }
 0x2b6   :  { %255 = shalt.err (!%p252_p4)
}
 0x2b7   :  { %s256_s17 = scalar_lea.hbm %s357_s5, 32 }
 0x2b8   :  { %p257_p5 = scmp.ne.s32.totalorder %s357_s5, %s256_s17  ;;  %p260_p6 = scmp.lt.u32.totalorder %s256_s17, %s357_s5 }
 0x2ba   :  { %p262_p7 = pnand %p260_p6, %p257_p5 }
 0x2bc   :  { %265 = shalt.err (!%p262_p7)
}
 0x2bd   :  { %184 = dma.vmem_to_hbm [thread:$0]  %s182_s2, 32, %s357_s5, [#allocation3]  }
 0x2be   :  { %266 = dma.done.wait [#allocation3], 32  }
 0x2bf   :  { %267 = vsyncadd [#allocation3], 4294967264 }
 0x2c0   :  { %188 = vsyncpa [#allocation3], 1 }

</bundles_post_ra>
